<compile_context>
chip_gen: v7x
topology: tpu7x:2x2x1
jax: 0.10.0
libtpu: 0.0.40
codegen_flags: <defaults>
</compile_context>

<pallas_src>
import functools

import jax
import jax.numpy as jnp
from jax import lax
from jax.experimental import pallas as pl
from jax.experimental.pallas import tpu as pltpu


# ---------------------------------------------------------------------------
# Pallas kernel: conv-as-GEMM + bias + optional InstanceNorm + optional LeakyReLU
# ---------------------------------------------------------------------------
def _conv_in_lrelu_kernel(x_ref, w_ref, b_ref, o_ref, *, use_norm, slope, eps):
    # x_ref: (K, M)    bf16  im2col patches of ONE image (K = kh*kw*Cin, M = OH*OW)
    # w_ref: (Cout, K) bf16  pre-packed weights
    # b_ref: (Cout, 1) f32   bias
    # o_ref: (Cout, M) f32   channels-first output: spatial axis is lane-dense
    acc = jnp.dot(w_ref[...], x_ref[...], preferred_element_type=jnp.float32)
    acc = acc + b_ref[...]                       # broadcast bias over spatial lanes
    if use_norm:
        # InstanceNorm2d(affine=False): per-channel stats over the spatial axis,
        # biased variance, eps inside rsqrt — matches PyTorch. Kept in f32.
        mean = jnp.mean(acc, axis=1, keepdims=True)
        var = jnp.mean(jnp.square(acc - mean), axis=1, keepdims=True)
        acc = (acc - mean) * lax.rsqrt(var + eps)
    if slope is not None:
        acc = jnp.where(acc >= 0, acc, slope * acc)   # LeakyReLU(0.2)
    o_ref[...] = acc.astype(o_ref.dtype)


def _conv_in_lrelu(patches, w_mat, bias, *, use_norm, slope, eps=1e-5):
    """patches (N,K,M) bf16, w_mat (Cout,K) bf16, bias (Cout,1) f32 -> (N,Cout,M) f32."""
    N, K, M = patches.shape
    Cout = w_mat.shape[0]
    kernel = functools.partial(_conv_in_lrelu_kernel, use_norm=use_norm,
                               slope=slope, eps=eps)
    return pl.pallas_call(
        kernel,
        out_shape=jax.ShapeDtypeStruct((N, Cout, M), jnp.float32),
        grid=(N,),
        in_specs=[
            pl.BlockSpec((None, K, M), lambda n: (n, 0, 0)),   # one image's patches
            pl.BlockSpec((Cout, K), lambda n: (0, 0)),         # weights (replicated)
            pl.BlockSpec((Cout, 1), lambda n: (0, 0)),         # bias (replicated)
        ],
        out_specs=pl.BlockSpec((None, Cout, M), lambda n: (n, 0, 0)),
        compiler_params=pltpu.CompilerParams(
            dimension_semantics=("parallel",)),                # batch-parallel (megacore)
    )(patches, w_mat, bias)


# ---------------------------------------------------------------------------
# Thin XLA glue: NCHW im2col producing (K, M)-transposed patches (no M padding)
# ---------------------------------------------------------------------------
def _im2col_nchw(x, kh, kw, stride, pad):
    """(N,C,H,W) -> patches (N, kh*kw*C, OH*OW), OH, OW.  Pure layout glue."""
    N, C, H, W = x.shape
    OH = (H + 2 * pad - kh) // stride + 1
    OW = (W + 2 * pad - kw) // stride + 1
    xp = jnp.pad(x, ((0, 0), (0, 0), (pad, pad), (pad, pad)))
    cols = []
    for i in range(kh):
        for j in range(kw):
            cols.append(xp[:, :,
                           i:i + stride * (OH - 1) + 1:stride,
                           j:j + stride * (OW - 1) + 1:stride])
    p = jnp.stack(cols, axis=1)                  # (N, kh*kw, C, OH, OW)
    return p.reshape(N, kh * kw * C, OH * OW), OH, OW


# ---------------------------------------------------------------------------
# Discriminator: parameter init + forward
# ---------------------------------------------------------------------------
def init_discriminator_params(key, input_nc=3, ndf=8, n_layers=3, kw=4):
    """Synthetic parameters matching the PyTorch layer shapes (OIHW weights),
    pre-packed for the transposed GEMM ((Cout, K) bf16, K ordered (kh, kw, cin))."""
    cfgs = [(input_nc, ndf, 2, False, 0.2)]          # (cin, cout, stride, norm, slope)
    nf_mult = 1
    for n in range(1, n_layers):
        nf_mult_prev, nf_mult = nf_mult, min(2 ** n, 8)
        cfgs.append((ndf * nf_mult_prev, ndf * nf_mult, 2, True, 0.2))
    nf_mult_prev, nf_mult = nf_mult, min(2 ** n_layers, 8)
    cfgs.append((ndf * nf_mult_prev, ndf * nf_mult, 1, True, 0.2))
    cfgs.append((ndf * nf_mult, 1, 1, False, None))  # final 1-channel prediction map

    params = []
    for (cin, cout, stride, use_norm, slope) in cfgs:
        key, k1, k2 = jax.random.split(key, 3)
        w = jax.random.normal(k1, (cout, cin, kw, kw), jnp.float32) * 0.05   # OIHW
        b = jax.random.normal(k2, (cout,), jnp.float32) * 0.05
        w_mat = jnp.transpose(w, (0, 2, 3, 1)).reshape(cout, kw * kw * cin)
        params.append(dict(
            w=w, b=b,                                  # PyTorch-layout (for reference)
            w_mat=w_mat.astype(jnp.bfloat16),          # (Cout, K) bf16 MXU operand
            b_col=b.reshape(cout, 1),                  # (Cout, 1) f32
            stride=stride, use_norm=use_norm, slope=slope))
    return params


def discriminator_forward(x_nchw, params):
    """Forward pass.  Accepts and returns NCHW, matching the PyTorch module."""
    x = x_nchw.astype(jnp.float32)
    N = x.shape[0]
    for p in params:
        patches, OH, OW = _im2col_nchw(x, 4, 4, p["stride"], 1)
        out = _conv_in_lrelu(patches.astype(jnp.bfloat16),   # bf16 MXU operands
                             p["w_mat"], p["b_col"],
                             use_norm=p["use_norm"], slope=p["slope"])
        x = out.reshape(N, -1, OH, OW)                        # (N, Cout, OH, OW)
    return x


# ---------------------------------------------------------------------------
# Pure-JAX f32 reference (for validation only)
# ---------------------------------------------------------------------------
def _reference_forward(x_nchw, params, eps=1e-5):
    x = x_nchw.astype(jnp.float32)
    for p in params:
        x = lax.conv_general_dilated(
            x, p["w"], window_strides=(p["stride"], p["stride"]),
            padding=((1, 1), (1, 1)),
            dimension_numbers=("NCHW", "OIHW", "NCHW"))
        x = x + p["b"].reshape(1, -1, 1, 1)
        if p["use_norm"]:
            mean = jnp.mean(x, axis=(2, 3), keepdims=True)
            var = jnp.mean(jnp.square(x - mean), axis=(2, 3), keepdims=True)
            x = (x - mean) * lax.rsqrt(var + eps)
        if p["slope"] is not None:
            x = jnp.where(x >= 0, x, p["slope"] * x)
    return x


# ---------------------------------------------------------------------------
if __name__ == "__main__":
    key = jax.random.PRNGKey(0)
    key, pkey, xkey = jax.random.split(key, 3)

    # Small, module-consistent shapes: batch=2, input_nc=3, spatial=32, ndf=8.
    input_nc, ndf, n_layers = 3, 8, 3
    params = init_discriminator_params(pkey, input_nc=input_nc, ndf=ndf,
                                       n_layers=n_layers)
    x = jax.random.normal(xkey, (2, input_nc, 32, 32), jnp.float32)

    fwd = jax.jit(functools.partial(discriminator_forward, params=params))
    out = jax.block_until_ready(fwd(x))

    # 32 -> 16 -> 8 -> 4 -> 3 -> 2 spatial; 1 output channel (PatchGAN map).
    assert out.shape == (2, 1, 2, 2), out.shape
    assert bool(jnp.all(jnp.isfinite(out)))

    # Validate against a pure f32 reference (bf16 MXU operands give a small,
    # bounded deviation; accumulation and the norm/activation epilogue are f32).
    ref = _reference_forward(x, params)
    max_diff = float(jnp.max(jnp.abs(out - ref)))
    assert max_diff < 0.2, max_diff

    print("KERNEL_OK")
</pallas_src>

<mosaic_0001>
module attributes {stable_mosaic.version = 11 : i64} {
  func.func @_conv_in_lrelu_kernel(%arg0: i32, %arg1: memref<1x48x256xbf16, #tpu.memory_space<vmem>>, %arg2: memref<8x48xbf16, #tpu.memory_space<vmem>>, %arg3: memref<8x1xf32, #tpu.memory_space<vmem>>, %arg4: memref<1x8x256xf32, #tpu.memory_space<vmem>>) attributes {dimension_semantics = [#tpu.dimension_semantics<parallel>], iteration_bounds = array<i64: 2>, scalar_prefetch = 0 : i64, scratch_operands = 0 : i64, tpu.core_type = #tpu.core_type<tc>, window_params = [{transform_indices = @transform_0, window_bounds = array<i64: 1, 48, 256>}, {pipeline_mode = #tpu.pipeline_mode<synchronous>, transform_indices = @transform_1, window_bounds = array<i64: 8, 48>}, {pipeline_mode = #tpu.pipeline_mode<synchronous>, transform_indices = @transform_2, window_bounds = array<i64: 8, 1>}, {transform_indices = @transform_3, window_bounds = array<i64: 1, 8, 256>}]} {
    %c0 = arith.constant 0 : index
    %c0_0 = arith.constant 0 : index
    %0 = vector.load %arg2[%c0, %c0_0] : memref<8x48xbf16, #tpu.memory_space<vmem>>, vector<8x48xbf16>
    %c0_1 = arith.constant 0 : index
    %c0_2 = arith.constant 0 : index
    %c0_3 = arith.constant 0 : index
    %1 = vector.load %arg1[%c0_1, %c0_2, %c0_3] : memref<1x48x256xbf16, #tpu.memory_space<vmem>>, vector<1x48x256xbf16>
    %2 = vector.shape_cast %1 : vector<1x48x256xbf16> to vector<48x256xbf16>
    %cst = arith.constant dense<0.000000e+00> : vector<8x256xf32>
    %3 = tpu.matmul %0, %2, %cst {dimension_numbers = #tpu.dot_dimension_numbers<[1], [0], [0], [1], [0, 0, 1, 1], [], []>} : vector<8x48xbf16>, vector<48x256xbf16>, vector<8x256xf32> -> vector<8x256xf32>
    %c0_4 = arith.constant 0 : index
    %c0_5 = arith.constant 0 : index
    %4 = vector.load %arg3[%c0_4, %c0_5] : memref<8x1xf32, #tpu.memory_space<vmem>>, vector<8x1xf32>
    %5 = vector.broadcast %4 : vector<8x1xf32> to vector<8x256xf32>
    %6 = arith.addf %3, %5 : vector<8x256xf32>
    %cst_6 = arith.constant 0.000000e+00 : f32
    %7 = vector.broadcast %cst_6 : f32 to vector<8x256xf32>
    %8 = arith.cmpf oge, %6, %7 : vector<8x256xf32>
    %cst_7 = arith.constant 2.000000e-01 : f32
    %9 = vector.broadcast %cst_7 : f32 to vector<8x256xf32>
    %10 = arith.mulf %9, %6 : vector<8x256xf32>
    %11 = arith.select %8, %6, %10 : vector<8x256xi1>, vector<8x256xf32>
    %c0_8 = arith.constant 0 : index
    %c0_9 = arith.constant 0 : index
    %c0_10 = arith.constant 0 : index
    %12 = vector.load %arg4[%c0_8, %c0_9, %c0_10] : memref<1x8x256xf32, #tpu.memory_space<vmem>>, vector<1x8x256xf32>
    %13 = vector.shape_cast %12 : vector<1x8x256xf32> to vector<8x256xf32>
    %14 = vector.shape_cast %11 : vector<8x256xf32> to vector<1x8x256xf32>
    tpu.vector_store %arg4[%c0_8, %c0_9, %c0_10], %14 {strides = array<i32>} : memref<1x8x256xf32, #tpu.memory_space<vmem>>, vector<1x8x256xf32>,
    return
  }
  func.func @transform_0(%arg0: i32) -> (i32, i32, i32) {
    %c0_i32 = arith.constant 0 : i32
    %c0_i32_0 = arith.constant 0 : i32
    %c0_i32_1 = arith.constant 0 : i32
    return %arg0, %c0_i32, %c0_i32_0 : i32, i32, i32
  }
  func.func @transform_1(%arg0: i32) -> (i32, i32) {
    %c0_i32 = arith.constant 0 : i32
    %c0_i32_0 = arith.constant 0 : i32
    %c0_i32_1 = arith.constant 0 : i32
    return %c0_i32, %c0_i32_0 : i32, i32
  }
  func.func @transform_2(%arg0: i32) -> (i32, i32) {
    %c0_i32 = arith.constant 0 : i32
    %c0_i32_0 = arith.constant 0 : i32
    %c0_i32_1 = arith.constant 0 : i32
    return %c0_i32, %c0_i32_0 : i32, i32
  }
  func.func @transform_3(%arg0: i32) -> (i32, i32, i32) {
    %c0_i32 = arith.constant 0 : i32
    %c0_i32_0 = arith.constant 0 : i32
    %c0_i32_1 = arith.constant 0 : i32
    return %arg0, %c0_i32, %c0_i32_0 : i32, i32, i32
  }
}

module attributes {stable_mosaic.version = 11 : i64} {
  func.func @_conv_in_lrelu_kernel(%arg0: i32, %arg1: memref<1x128x64xbf16, #tpu.memory_space<vmem>>, %arg2: memref<16x128xbf16, #tpu.memory_space<vmem>>, %arg3: memref<16x1xf32, #tpu.memory_space<vmem>>, %arg4: memref<1x16x64xf32, #tpu.memory_space<vmem>>) attributes {dimension_semantics = [#tpu.dimension_semantics<parallel>], iteration_bounds = array<i64: 2>, scalar_prefetch = 0 : i64, scratch_operands = 0 : i64, tpu.core_type = #tpu.core_type<tc>, window_params = [{transform_indices = @transform_0, window_bounds = array<i64: 1, 128, 64>}, {pipeline_mode = #tpu.pipeline_mode<synchronous>, transform_indices = @transform_1, window_bounds = array<i64: 16, 128>}, {pipeline_mode = #tpu.pipeline_mode<synchronous>, transform_indices = @transform_2, window_bounds = array<i64: 16, 1>}, {transform_indices = @transform_3, window_bounds = array<i64: 1, 16, 64>}]} {
    %c0 = arith.constant 0 : index
    %c0_0 = arith.constant 0 : index
    %0 = vector.load %arg2[%c0, %c0_0] : memref<16x128xbf16, #tpu.memory_space<vmem>>, vector<16x128xbf16>
    %c0_1 = arith.constant 0 : index
    %c0_2 = arith.constant 0 : index
    %c0_3 = arith.constant 0 : index
    %1 = vector.load %arg1[%c0_1, %c0_2, %c0_3] : memref<1x128x64xbf16, #tpu.memory_space<vmem>>, vector<1x128x64xbf16>
    %2 = vector.shape_cast %1 : vector<1x128x64xbf16> to vector<128x64xbf16>
    %cst = arith.constant dense<0.000000e+00> : vector<16x64xf32>
    %3 = tpu.matmul %0, %2, %cst {dimension_numbers = #tpu.dot_dimension_numbers<[1], [0], [0], [1], [0, 0, 1, 1], [], []>} : vector<16x128xbf16>, vector<128x64xbf16>, vector<16x64xf32> -> vector<16x64xf32>
    %c0_4 = arith.constant 0 : index
    %c0_5 = arith.constant 0 : index
    %4 = vector.load %arg3[%c0_4, %c0_5] : memref<16x1xf32, #tpu.memory_space<vmem>>, vector<16x1xf32>
    %5 = vector.broadcast %4 : vector<16x1xf32> to vector<16x64xf32>
    %6 = arith.addf %3, %5 : vector<16x64xf32>
    %cst_6 = arith.constant dense<0.000000e+00> : vector<16xf32>
    %7 = vector.multi_reduction <add>, %6, %cst_6 [1] : vector<16x64xf32> to vector<16xf32>
    %8 = vector.shape_cast %7 : vector<16xf32> to vector<16x1xf32>
    %cst_7 = arith.constant 6.400000e+01 : f32
    %9 = vector.broadcast %cst_7 : f32 to vector<16x1xf32>
    %10 = arith.divf %8, %9 : vector<16x1xf32>
    %11 = vector.broadcast %10 : vector<16x1xf32> to vector<16x64xf32>
    %12 = arith.subf %6, %11 : vector<16x64xf32>
    %13 = arith.mulf %12, %12 : vector<16x64xf32>
    %cst_8 = arith.constant dense<0.000000e+00> : vector<16xf32>
    %14 = vector.multi_reduction <add>, %13, %cst_8 [1] : vector<16x64xf32> to vector<16xf32>
    %15 = vector.shape_cast %14 : vector<16xf32> to vector<16x1xf32>
    %cst_9 = arith.constant 6.400000e+01 : f32
    %16 = vector.broadcast %cst_9 : f32 to vector<16x1xf32>
    %17 = arith.divf %15, %16 : vector<16x1xf32>
    %18 = vector.broadcast %10 : vector<16x1xf32> to vector<16x64xf32>
    %19 = arith.subf %6, %18 : vector<16x64xf32>
    %cst_10 = arith.constant 9.99999974E-6 : f32
    %20 = vector.broadcast %cst_10 : f32 to vector<16x1xf32>
    %21 = arith.addf %17, %20 : vector<16x1xf32>
    %22 = math.rsqrt %21 : vector<16x1xf32>
    %23 = vector.broadcast %22 : vector<16x1xf32> to vector<16x64xf32>
    %24 = arith.mulf %19, %23 : vector<16x64xf32>
    %cst_11 = arith.constant 0.000000e+00 : f32
    %25 = vector.broadcast %cst_11 : f32 to vector<16x64xf32>
    %26 = arith.cmpf oge, %24, %25 : vector<16x64xf32>
    %cst_12 = arith.constant 2.000000e-01 : f32
    %27 = vector.broadcast %cst_12 : f32 to vector<16x64xf32>
    %28 = arith.mulf %27, %24 : vector<16x64xf32>
    %29 = arith.select %26, %24, %28 : vector<16x64xi1>, vector<16x64xf32>
    %c0_13 = arith.constant 0 : index
    %c0_14 = arith.constant 0 : index
    %c0_15 = arith.constant 0 : index
    %30 = vector.load %arg4[%c0_13, %c0_14, %c0_15] : memref<1x16x64xf32, #tpu.memory_space<vmem>>, vector<1x16x64xf32>
    %31 = vector.shape_cast %30 : vector<1x16x64xf32> to vector<16x64xf32>
    %32 = vector.shape_cast %29 : vector<16x64xf32> to vector<1x16x64xf32>
    tpu.vector_store %arg4[%c0_13, %c0_14, %c0_15], %32 {strides = array<i32>} : memref<1x16x64xf32, #tpu.memory_space<vmem>>, vector<1x16x64xf32>,
    return
  }
  func.func @transform_0(%arg0: i32) -> (i32, i32, i32) {
    %c0_i32 = arith.constant 0 : i32
    %c0_i32_0 = arith.constant 0 : i32
    %c0_i32_1 = arith.constant 0 : i32
    return %arg0, %c0_i32, %c0_i32_0 : i32, i32, i32
  }
  func.func @transform_1(%arg0: i32) -> (i32, i32) {
    %c0_i32 = arith.constant 0 : i32
    %c0_i32_0 = arith.constant 0 : i32
    %c0_i32_1 = arith.constant 0 : i32
    return %c0_i32, %c0_i32_0 : i32, i32
  }
  func.func @transform_2(%arg0: i32) -> (i32, i32) {
    %c0_i32 = arith.constant 0 : i32
    %c0_i32_0 = arith.constant 0 : i32
    %c0_i32_1 = arith.constant 0 : i32
    return %c0_i32, %c0_i32_0 : i32, i32
  }
  func.func @transform_3(%arg0: i32) -> (i32, i32, i32) {
    %c0_i32 = arith.constant 0 : i32
    %c0_i32_0 = arith.constant 0 : i32
    %c0_i32_1 = arith.constant 0 : i32
    return %arg0, %c0_i32, %c0_i32_0 : i32, i32, i32
  }
}

module attributes {stable_mosaic.version = 11 : i64} {
  func.func @_conv_in_lrelu_kernel(%arg0: i32, %arg1: memref<1x256x16xbf16, #tpu.memory_space<vmem>>, %arg2: memref<32x256xbf16, #tpu.memory_space<vmem>>, %arg3: memref<32x1xf32, #tpu.memory_space<vmem>>, %arg4: memref<1x32x16xf32, #tpu.memory_space<vmem>>) attributes {dimension_semantics = [#tpu.dimension_semantics<parallel>], iteration_bounds = array<i64: 2>, scalar_prefetch = 0 : i64, scratch_operands = 0 : i64, tpu.core_type = #tpu.core_type<tc>, window_params = [{transform_indices = @transform_0, window_bounds = array<i64: 1, 256, 16>}, {pipeline_mode = #tpu.pipeline_mode<synchronous>, transform_indices = @transform_1, window_bounds = array<i64: 32, 256>}, {pipeline_mode = #tpu.pipeline_mode<synchronous>, transform_indices = @transform_2, window_bounds = array<i64: 32, 1>}, {transform_indices = @transform_3, window_bounds = array<i64: 1, 32, 16>}]} {
    %c0 = arith.constant 0 : index
    %c0_0 = arith.constant 0 : index
    %0 = vector.load %arg2[%c0, %c0_0] : memref<32x256xbf16, #tpu.memory_space<vmem>>, vector<32x256xbf16>
    %c0_1 = arith.constant 0 : index
    %c0_2 = arith.constant 0 : index
    %c0_3 = arith.constant 0 : index
    %1 = vector.load %arg1[%c0_1, %c0_2, %c0_3] : memref<1x256x16xbf16, #tpu.memory_space<vmem>>, vector<1x256x16xbf16>
    %2 = vector.shape_cast %1 : vector<1x256x16xbf16> to vector<256x16xbf16>
    %cst = arith.constant dense<0.000000e+00> : vector<32x16xf32>
    %3 = tpu.matmul %0, %2, %cst {dimension_numbers = #tpu.dot_dimension_numbers<[1], [0], [0], [1], [0, 0, 1, 1], [], []>} : vector<32x256xbf16>, vector<256x16xbf16>, vector<32x16xf32> -> vector<32x16xf32>
    %c0_4 = arith.constant 0 : index
    %c0_5 = arith.constant 0 : index
    %4 = vector.load %arg3[%c0_4, %c0_5] : memref<32x1xf32, #tpu.memory_space<vmem>>, vector<32x1xf32>
    %5 = vector.broadcast %4 : vector<32x1xf32> to vector<32x16xf32>
    %6 = arith.addf %3, %5 : vector<32x16xf32>
    %cst_6 = arith.constant dense<0.000000e+00> : vector<32xf32>
    %7 = vector.multi_reduction <add>, %6, %cst_6 [1] : vector<32x16xf32> to vector<32xf32>
    %8 = vector.shape_cast %7 : vector<32xf32> to vector<32x1xf32>
    %cst_7 = arith.constant 1.600000e+01 : f32
    %9 = vector.broadcast %cst_7 : f32 to vector<32x1xf32>
    %10 = arith.divf %8, %9 : vector<32x1xf32>
    %11 = vector.broadcast %10 : vector<32x1xf32> to vector<32x16xf32>
    %12 = arith.subf %6, %11 : vector<32x16xf32>
    %13 = arith.mulf %12, %12 : vector<32x16xf32>
    %cst_8 = arith.constant dense<0.000000e+00> : vector<32xf32>
    %14 = vector.multi_reduction <add>, %13, %cst_8 [1] : vector<32x16xf32> to vector<32xf32>
    %15 = vector.shape_cast %14 : vector<32xf32> to vector<32x1xf32>
    %cst_9 = arith.constant 1.600000e+01 : f32
    %16 = vector.broadcast %cst_9 : f32 to vector<32x1xf32>
    %17 = arith.divf %15, %16 : vector<32x1xf32>
    %18 = vector.broadcast %10 : vector<32x1xf32> to vector<32x16xf32>
    %19 = arith.subf %6, %18 : vector<32x16xf32>
    %cst_10 = arith.constant 9.99999974E-6 : f32
    %20 = vector.broadcast %cst_10 : f32 to vector<32x1xf32>
    %21 = arith.addf %17, %20 : vector<32x1xf32>
    %22 = math.rsqrt %21 : vector<32x1xf32>
    %23 = vector.broadcast %22 : vector<32x1xf32> to vector<32x16xf32>
    %24 = arith.mulf %19, %23 : vector<32x16xf32>
    %cst_11 = arith.constant 0.000000e+00 : f32
    %25 = vector.broadcast %cst_11 : f32 to vector<32x16xf32>
    %26 = arith.cmpf oge, %24, %25 : vector<32x16xf32>
    %cst_12 = arith.constant 2.000000e-01 : f32
    %27 = vector.broadcast %cst_12 : f32 to vector<32x16xf32>
    %28 = arith.mulf %27, %24 : vector<32x16xf32>
    %29 = arith.select %26, %24, %28 : vector<32x16xi1>, vector<32x16xf32>
    %c0_13 = arith.constant 0 : index
    %c0_14 = arith.constant 0 : index
    %c0_15 = arith.constant 0 : index
    %30 = vector.load %arg4[%c0_13, %c0_14, %c0_15] : memref<1x32x16xf32, #tpu.memory_space<vmem>>, vector<1x32x16xf32>
    %31 = vector.shape_cast %30 : vector<1x32x16xf32> to vector<32x16xf32>
    %32 = vector.shape_cast %29 : vector<32x16xf32> to vector<1x32x16xf32>
    tpu.vector_store %arg4[%c0_13, %c0_14, %c0_15], %32 {strides = array<i32>} : memref<1x32x16xf32, #tpu.memory_space<vmem>>, vector<1x32x16xf32>,
    return
  }
  func.func @transform_0(%arg0: i32) -> (i32, i32, i32) {
    %c0_i32 = arith.constant 0 : i32
    %c0_i32_0 = arith.constant 0 : i32
    %c0_i32_1 = arith.constant 0 : i32
    return %arg0, %c0_i32, %c0_i32_0 : i32, i32, i32
  }
  func.func @transform_1(%arg0: i32) -> (i32, i32) {
    %c0_i32 = arith.constant 0 : i32
    %c0_i32_0 = arith.constant 0 : i32
    %c0_i32_1 = arith.constant 0 : i32
    return %c0_i32, %c0_i32_0 : i32, i32
  }
  func.func @transform_2(%arg0: i32) -> (i32, i32) {
    %c0_i32 = arith.constant 0 : i32
    %c0_i32_0 = arith.constant 0 : i32
    %c0_i32_1 = arith.constant 0 : i32
    return %c0_i32, %c0_i32_0 : i32, i32
  }
  func.func @transform_3(%arg0: i32) -> (i32, i32, i32) {
    %c0_i32 = arith.constant 0 : i32
    %c0_i32_0 = arith.constant 0 : i32
    %c0_i32_1 = arith.constant 0 : i32
    return %arg0, %c0_i32, %c0_i32_0 : i32, i32, i32
  }
}

module attributes {stable_mosaic.version = 11 : i64} {
  func.func @_conv_in_lrelu_kernel(%arg0: i32, %arg1: memref<1x512x9xbf16, #tpu.memory_space<vmem>>, %arg2: memref<64x512xbf16, #tpu.memory_space<vmem>>, %arg3: memref<64x1xf32, #tpu.memory_space<vmem>>, %arg4: memref<1x64x9xf32, #tpu.memory_space<vmem>>) attributes {dimension_semantics = [#tpu.dimension_semantics<parallel>], iteration_bounds = array<i64: 2>, scalar_prefetch = 0 : i64, scratch_operands = 0 : i64, tpu.core_type = #tpu.core_type<tc>, window_params = [{transform_indices = @transform_0, window_bounds = array<i64: 1, 512, 9>}, {pipeline_mode = #tpu.pipeline_mode<synchronous>, transform_indices = @transform_1, window_bounds = array<i64: 64, 512>}, {pipeline_mode = #tpu.pipeline_mode<synchronous>, transform_indices = @transform_2, window_bounds = array<i64: 64, 1>}, {transform_indices = @transform_3, window_bounds = array<i64: 1, 64, 9>}]} {
    %c0 = arith.constant 0 : index
    %c0_0 = arith.constant 0 : index
    %0 = vector.load %arg2[%c0, %c0_0] : memref<64x512xbf16, #tpu.memory_space<vmem>>, vector<64x512xbf16>
    %c0_1 = arith.constant 0 : index
    %c0_2 = arith.constant 0 : index
    %c0_3 = arith.constant 0 : index
    %1 = vector.load %arg1[%c0_1, %c0_2, %c0_3] : memref<1x512x9xbf16, #tpu.memory_space<vmem>>, vector<1x512x9xbf16>
    %2 = vector.shape_cast %1 : vector<1x512x9xbf16> to vector<512x9xbf16>
    %cst = arith.constant dense<0.000000e+00> : vector<64x9xf32>
    %3 = tpu.matmul %0, %2, %cst {dimension_numbers = #tpu.dot_dimension_numbers<[1], [0], [0], [1], [0, 0, 1, 1], [], []>} : vector<64x512xbf16>, vector<512x9xbf16>, vector<64x9xf32> -> vector<64x9xf32>
    %c0_4 = arith.constant 0 : index
    %c0_5 = arith.constant 0 : index
    %4 = vector.load %arg3[%c0_4, %c0_5] : memref<64x1xf32, #tpu.memory_space<vmem>>, vector<64x1xf32>
    %5 = vector.broadcast %4 : vector<64x1xf32> to vector<64x9xf32>
    %6 = arith.addf %3, %5 : vector<64x9xf32>
    %cst_6 = arith.constant dense<0.000000e+00> : vector<64xf32>
    %7 = vector.multi_reduction <add>, %6, %cst_6 [1] : vector<64x9xf32> to vector<64xf32>
    %8 = vector.shape_cast %7 : vector<64xf32> to vector<64x1xf32>
    %cst_7 = arith.constant 9.000000e+00 : f32
    %9 = vector.broadcast %cst_7 : f32 to vector<64x1xf32>
    %10 = arith.divf %8, %9 : vector<64x1xf32>
    %11 = vector.broadcast %10 : vector<64x1xf32> to vector<64x9xf32>
    %12 = arith.subf %6, %11 : vector<64x9xf32>
    %13 = arith.mulf %12, %12 : vector<64x9xf32>
    %cst_8 = arith.constant dense<0.000000e+00> : vector<64xf32>
    %14 = vector.multi_reduction <add>, %13, %cst_8 [1] : vector<64x9xf32> to vector<64xf32>
    %15 = vector.shape_cast %14 : vector<64xf32> to vector<64x1xf32>
    %cst_9 = arith.constant 9.000000e+00 : f32
    %16 = vector.broadcast %cst_9 : f32 to vector<64x1xf32>
    %17 = arith.divf %15, %16 : vector<64x1xf32>
    %18 = vector.broadcast %10 : vector<64x1xf32> to vector<64x9xf32>
    %19 = arith.subf %6, %18 : vector<64x9xf32>
    %cst_10 = arith.constant 9.99999974E-6 : f32
    %20 = vector.broadcast %cst_10 : f32 to vector<64x1xf32>
    %21 = arith.addf %17, %20 : vector<64x1xf32>
    %22 = math.rsqrt %21 : vector<64x1xf32>
    %23 = vector.broadcast %22 : vector<64x1xf32> to vector<64x9xf32>
    %24 = arith.mulf %19, %23 : vector<64x9xf32>
    %cst_11 = arith.constant 0.000000e+00 : f32
    %25 = vector.broadcast %cst_11 : f32 to vector<64x9xf32>
    %26 = arith.cmpf oge, %24, %25 : vector<64x9xf32>
    %cst_12 = arith.constant 2.000000e-01 : f32
    %27 = vector.broadcast %cst_12 : f32 to vector<64x9xf32>
    %28 = arith.mulf %27, %24 : vector<64x9xf32>
    %29 = arith.select %26, %24, %28 : vector<64x9xi1>, vector<64x9xf32>
    %c0_13 = arith.constant 0 : index
    %c0_14 = arith.constant 0 : index
    %c0_15 = arith.constant 0 : index
    %30 = vector.load %arg4[%c0_13, %c0_14, %c0_15] : memref<1x64x9xf32, #tpu.memory_space<vmem>>, vector<1x64x9xf32>
    %31 = vector.shape_cast %30 : vector<1x64x9xf32> to vector<64x9xf32>
    %32 = vector.shape_cast %29 : vector<64x9xf32> to vector<1x64x9xf32>
    tpu.vector_store %arg4[%c0_13, %c0_14, %c0_15], %32 {strides = array<i32>} : memref<1x64x9xf32, #tpu.memory_space<vmem>>, vector<1x64x9xf32>,
    return
  }
  func.func @transform_0(%arg0: i32) -> (i32, i32, i32) {
    %c0_i32 = arith.constant 0 : i32
    %c0_i32_0 = arith.constant 0 : i32
    %c0_i32_1 = arith.constant 0 : i32
    return %arg0, %c0_i32, %c0_i32_0 : i32, i32, i32
  }
  func.func @transform_1(%arg0: i32) -> (i32, i32) {
    %c0_i32 = arith.constant 0 : i32
    %c0_i32_0 = arith.constant 0 : i32
    %c0_i32_1 = arith.constant 0 : i32
    return %c0_i32, %c0_i32_0 : i32, i32
  }
  func.func @transform_2(%arg0: i32) -> (i32, i32) {
    %c0_i32 = arith.constant 0 : i32
    %c0_i32_0 = arith.constant 0 : i32
    %c0_i32_1 = arith.constant 0 : i32
    return %c0_i32, %c0_i32_0 : i32, i32
  }
  func.func @transform_3(%arg0: i32) -> (i32, i32, i32) {
    %c0_i32 = arith.constant 0 : i32
    %c0_i32_0 = arith.constant 0 : i32
    %c0_i32_1 = arith.constant 0 : i32
    return %arg0, %c0_i32, %c0_i32_0 : i32, i32, i32
  }
}

module attributes {stable_mosaic.version = 11 : i64} {
  func.func @_conv_in_lrelu_kernel(%arg0: i32, %arg1: memref<1x1024x4xbf16, #tpu.memory_space<vmem>>, %arg2: memref<1x1024xbf16, #tpu.memory_space<vmem>>, %arg3: memref<1x1xf32, #tpu.memory_space<vmem>>, %arg4: memref<1x1x4xf32, #tpu.memory_space<vmem>>) attributes {dimension_semantics = [#tpu.dimension_semantics<parallel>], iteration_bounds = array<i64: 2>, scalar_prefetch = 0 : i64, scratch_operands = 0 : i64, tpu.core_type = #tpu.core_type<tc>, window_params = [{transform_indices = @transform_0, window_bounds = array<i64: 1, 1024, 4>}, {pipeline_mode = #tpu.pipeline_mode<synchronous>, transform_indices = @transform_1, window_bounds = array<i64: 1, 1024>}, {pipeline_mode = #tpu.pipeline_mode<synchronous>, transform_indices = @transform_2, window_bounds = array<i64: 1, 1>}, {transform_indices = @transform_3, window_bounds = array<i64: 1, 1, 4>}]} {
    %c0 = arith.constant 0 : index
    %c0_0 = arith.constant 0 : index
    %0 = vector.load %arg2[%c0, %c0_0] : memref<1x1024xbf16, #tpu.memory_space<vmem>>, vector<1x1024xbf16>
    %c0_1 = arith.constant 0 : index
    %c0_2 = arith.constant 0 : index
    %c0_3 = arith.constant 0 : index
    %1 = vector.load %arg1[%c0_1, %c0_2, %c0_3] : memref<1x1024x4xbf16, #tpu.memory_space<vmem>>, vector<1x1024x4xbf16>
    %2 = vector.shape_cast %1 : vector<1x1024x4xbf16> to vector<1024x4xbf16>
    %cst = arith.constant dense<0.000000e+00> : vector<1x4xf32>
    %3 = tpu.matmul %0, %2, %cst {dimension_numbers = #tpu.dot_dimension_numbers<[1], [0], [0], [1], [0, 0, 1, 1], [], []>} : vector<1x1024xbf16>, vector<1024x4xbf16>, vector<1x4xf32> -> vector<1x4xf32>
    %c0_4 = arith.constant 0 : index
    %c0_5 = arith.constant 0 : index
    %4 = vector.load %arg3[%c0_4, %c0_5] : memref<1x1xf32, #tpu.memory_space<vmem>>, vector<1x1xf32>
    %5 = vector.broadcast %4 : vector<1x1xf32> to vector<1x4xf32>
    %6 = arith.addf %3, %5 : vector<1x4xf32>
    %c0_6 = arith.constant 0 : index
    %c0_7 = arith.constant 0 : index
    %c0_8 = arith.constant 0 : index
    %7 = vector.load %arg4[%c0_6, %c0_7, %c0_8] : memref<1x1x4xf32, #tpu.memory_space<vmem>>, vector<1x1x4xf32>
    %8 = vector.shape_cast %7 : vector<1x1x4xf32> to vector<1x4xf32>
    %9 = vector.shape_cast %6 : vector<1x4xf32> to vector<1x1x4xf32>
    tpu.vector_store %arg4[%c0_6, %c0_7, %c0_8], %9 {strides = array<i32>} : memref<1x1x4xf32, #tpu.memory_space<vmem>>, vector<1x1x4xf32>,
    return
  }
  func.func @transform_0(%arg0: i32) -> (i32, i32, i32) {
    %c0_i32 = arith.constant 0 : i32
    %c0_i32_0 = arith.constant 0 : i32
    %c0_i32_1 = arith.constant 0 : i32
    return %arg0, %c0_i32, %c0_i32_0 : i32, i32, i32
  }
  func.func @transform_1(%arg0: i32) -> (i32, i32) {
    %c0_i32 = arith.constant 0 : i32
    %c0_i32_0 = arith.constant 0 : i32
    %c0_i32_1 = arith.constant 0 : i32
    return %c0_i32, %c0_i32_0 : i32, i32
  }
  func.func @transform_2(%arg0: i32) -> (i32, i32) {
    %c0_i32 = arith.constant 0 : i32
    %c0_i32_0 = arith.constant 0 : i32
    %c0_i32_1 = arith.constant 0 : i32
    return %c0_i32, %c0_i32_0 : i32, i32
  }
  func.func @transform_3(%arg0: i32) -> (i32, i32, i32) {
    %c0_i32 = arith.constant 0 : i32
    %c0_i32_0 = arith.constant 0 : i32
    %c0_i32_1 = arith.constant 0 : i32
    return %arg0, %c0_i32, %c0_i32_0 : i32, i32, i32
  }
}

</mosaic_0001>

<bundles_post_ra>
// kernel: discriminator_forward.5
= control target key start
LH: loop header
LB: loop body
LE: loop exit
PB: predicated region body
PF: predicated region fallthrough
CT: control target
= control target key end

     0   :  { %s390_s12 = smov 0   ;;  %s413_s0 = inlined_call_operand.vmem [shape: bf16[2,48,256], index: 0, kind: input, shape index: {}]   ;;  %s414_s1 = inlined_call_operand.vmem [shape: bf16[8,48], index: 1, kind: input, shape index: {}]   ;;  %s415_s2 = inlined_call_operand.vmem [shape: f32[8,1], index: 2, kind: input, shape index: {}]   ;;  %s416_s3 = inlined_call_operand.vmem [shape: f32[2,8,256], index: 3, kind: output, shape index: {}]  }
   0x1 LB: > { %s323_s13 = sadd.s32 4294967295, %s367_s12   ;;  %p327_p0 = scmp.ge.s32.totalorder %s367_s12, 1  ;;  %s367_s12 = sphi %s390_s12, %s13_s12  }
   0x2   : > { %p137_p1 = scmp.lt.s32.totalorder %s367_s12, 3 }
   0x4   : > { %p138_p2 = pnand %p327_p0, %p137_p1 }
   0x5   : > { %p161_p3 = scmp.lt.s32.totalorder (!%p138_p2), %s323_s13, 1  ;;  %v179_v0 = vld [vmem:[%s415_s2] sm:$0xff] (!%p138_p2)  ;;  %v369_v1 = vmov (!%p138_p2), 0   ;;  %vm215_vm0 = vcmask (!%p138_p2), 392192  }
   0x6   : > { %141 = sbr.rel (%p138_p2) target bundleno = 249 (0xf9), region = 32  ;;  %251 = vmatprep.mubr.bf16.mxu0 (!%p138_p2), %v369_v1  ;;  %351 = vset.pattern.permute.xlu0 (!%p138_p2), %v369_v1  ;;  %v172_v8 = vld [vmem:[%s414_s1] sm:$0xf] (!%p138_p2) }
   0x7   : > { %182 = vperm.xlu0 (!%p138_p2), %351, %v179_v0  }
   0xd   : > { %s418_s13 = smov (!%p161_p3, %s323_s13), 1 }
   0xe   : > { %s341_s16 = smul.u32 48, %s418_s13  ;;  %s340_s22 = sshll.u32 %s418_s13, 4 }
   0xf   : > { %s170_s25 = scalar_lea.vmem %s416_s3, %s340_s22 }
  0x10   : > { %s165_s19 = scalar_lea.vmem %s413_s0, %s341_s16 }
  0x11   : > { %v352_v2 = vld [vmem:[%s165_s19 + $0x4] ss:$8 sps:$4 sm:$0xff]   ;;  %v354_v3 = vld [vmem:[%s165_s19] ss:$8 sps:$4 sm:$0xff]   ;;  %v355_v4 = vld [vmem:[%s165_s19 + $0x14] ss:$8 sps:$4 sm:$0xff]  }
  0x12   : > { %219 = vmatprep.subr.bf16.mxu0 %v352_v2  ;;  %v357_v5 = vld [vmem:[%s165_s19 + $0x10] ss:$8 sps:$4 sm:$0xff]   ;;  %v358_v6 = vld [vmem:[%s165_s19 + $0x24] ss:$8 sps:$4 sm:$0xff]   ;;  %v360_v7 = vld [vmem:[%s165_s19 + $0x20] ss:$8 sps:$4 sm:$0xff]  }
  0x13   : > { %220 = vmatpush1.bf16.msra.mxu0 %v354_v3 }
  0x14   : > { %221 = vmatprep.subr.bf16.mxu0 %v355_v4 }
  0x17   : > { %222 = vmatpush1.bf16.msra.mxu0 %v357_v5 }
  0x18   : > { %223 = vmatprep.subr.bf16.mxu0 %v358_v6 }
  0x1b   : > { %224 = vmatpush1.bf16.msra.mxu0 %v360_v7 }
  0x1e   : > { %337 = vmatmul.mubr.msk.bf16.vlgmr.msra.gmra.mrb[0].mxu0 %vm215_vm0, %v172_v8 }
  0x86   : > { %v183_v9 = vpop.permute.xlu0 %182 }
  0xf1   : > { %v253_v10 = vpop.f32.mrb[0].mxu0 }
  0xf2   : > { %v254_v11 = vadd.f32 %v253_v10, %v183_v9  ;;  %v255_v12 = vpop.f32.mrb[1].mxu0 }
  0xf3   : > { %v256_v13 = vadd.f32 %v255_v12, %v183_v9  ;;  %v257_v14 = vpop.f32.mrb[2].mxu0 }
  0xf4   : > { %vm260_vm1 = vcmp.ge.f32.partialorder %v254_v11, 0.0  ;;  %v262_v15 = vmul.f32 0.2, %v254_v11  ;;  %v258_v16 = vpop.f32.mrb[3].mxu0 }
  0xf5   : > { %vm261_vm2 = vcmp.ge.f32.partialorder %v256_v13, 0.0  ;;  %v263_v17 = vmul.f32 0.2, %v256_v13 }
  0xf6   : > { %v264_v18 = vsel %vm260_vm1, %v254_v11, %v262_v15 }
  0xf7   : > { %266 = vst [vmem:[%s170_s25] sm:$0xff] %v264_v18  ;;  %v265_v19 = vsel %vm261_vm2, %v256_v13, %v263_v17 }
  0xf8   : > { %267 = vst [vmem:[%s170_s25 + $0x8] sm:$0xff] %v265_v19 }
  0xf9 PF: > { %s13_s12 = sadd.s32 1, %s367_s12  }
  0xfa   : > { %p10_p4 = scmp.ge.s32.totalorder %s13_s12, 4  }
  0xfc   :  { %12 = sbr.rel (!%p10_p4) target bundleno = 1 (0x1), region = 62 }

// kernel: discriminator_forward.6
= control target key start
LH: loop header
LB: loop body
LE: loop exit
PB: predicated region body
PF: predicated region fallthrough
CT: control target
= control target key end

     0   :  { %s495_s12 = smov 0   ;;  %s531_s0 = inlined_call_operand.vmem [shape: bf16[2,128,64], index: 0, kind: input, shape index: {}]   ;;  %s532_s1 = inlined_call_operand.vmem [shape: bf16[16,128], index: 1, kind: input, shape index: {}]   ;;  %s533_s2 = inlined_call_operand.vmem [shape: f32[16,1], index: 2, kind: input, shape index: {}]   ;;  %s534_s3 = inlined_call_operand.vmem [shape: f32[2,16,64], index: 3, kind: output, shape index: {}]  }
   0x1 LB: > { %s388_s13 = sadd.s32 4294967295, %s470_s12   ;;  %p392_p0 = scmp.ge.s32.totalorder %s470_s12, 1  ;;  %s470_s12 = sphi %s495_s12, %s13_s12  }
   0x2   : > { %p137_p1 = scmp.lt.s32.totalorder %s470_s12, 3 }
   0x4   : > { %p138_p2 = pnand %p392_p0, %p137_p1 }
   0x5   : > { %p161_p3 = scmp.lt.s32.totalorder (!%p138_p2), %s388_s13, 1  ;;  %v472_v0 = vmov (!%p138_p2), 0.0   ;;  %vm473_vm0 = vmmov (!%p138_p2), 0   ;;  %v190_v1 = vld [vmem:[%s533_s2] sm:$0xff] (!%p138_p2)  ;;  %v474_v2 = vmov (!%p138_p2), 0   ;;  %v191_v3 = vld [vmem:[%s533_s2 + $0x8] sm:$0xff] (!%p138_p2) }
   0x6   : > { %141 = sbr.rel (%p138_p2) target bundleno = 579 (0x243), region = 32  ;;  %419 = vmatprep.subr.bf16.mxu0 (!%p138_p2), %v472_v0  ;;  %435 = vmatprep.mubr.msk.bf16.mxu0 (!%p138_p2), %vm473_vm0, %v472_v0  ;;  %v459_v12 = vld [vmem:[%s532_s1] sm:$0xff] (!%p138_p2)   ;;  %vm297_vm1 = vcmask (!%p138_p2), 523264  }
   0x7   : > { %450 = vset.pattern.permute.xlu0 (!%p138_p2), %v474_v2 }
   0x8   : > { %194 = vperm.xlu0 (!%p138_p2), %450, %v190_v1  }
   0xc   : > { %199 = vperm.xlu0 (!%p138_p2), %450, %v191_v3  }
   0xd   : > { %s536_s13 = smov (!%p161_p3, %s388_s13), 1 }
   0xe   : > { %s408_s16 = sshll.u32 %s536_s13, 6  ;;  %s409_s24 = sshll.u32 %s536_s13, 4 }
   0xf   : > { %s165_s21 = scalar_lea.vmem %s531_s0, %s408_s16  ;;  %s170_s27 = scalar_lea.vmem %s534_s3, %s409_s24 }
  0x10   : > { %v451_v4 = vld [vmem:[%s165_s21] sm:$0xff]   ;;  %v452_v5 = vld [vmem:[%s165_s21 + $0x8] sm:$0xff]   ;;  %v453_v6 = vld [vmem:[%s165_s21 + $0x10] sm:$0xff]  }
  0x11   : > { %420 = vmatpush3.bf16.msra.mxu0 %v451_v4  ;;  %v454_v7 = vld [vmem:[%s165_s21 + $0x18] sm:$0xff]   ;;  %v455_v8 = vld [vmem:[%s165_s21 + $0x20] sm:$0xff]   ;;  %v456_v9 = vld [vmem:[%s165_s21 + $0x28] sm:$0xff]  }
  0x12   : > { %421 = vmatprep.subr.bf16.mxu0 %v472_v0  ;;  %v457_v10 = vld [vmem:[%s165_s21 + $0x30] sm:$0xff]   ;;  %v458_v11 = vld [vmem:[%s165_s21 + $0x38] sm:$0xff]  }
  0x15   : > { %422 = vmatpush3.bf16.msra.mxu0 %v452_v5 }
  0x16   : > { %423 = vmatprep.subr.bf16.mxu0 %v472_v0 }
  0x19   : > { %424 = vmatpush3.bf16.msra.mxu0 %v453_v6 }
  0x1a   : > { %425 = vmatprep.subr.bf16.mxu0 %v472_v0 }
  0x1d   : > { %426 = vmatpush3.bf16.msra.mxu0 %v454_v7 }
  0x1e   : > { %427 = vmatprep.subr.bf16.mxu0 %v472_v0 }
  0x21   : > { %428 = vmatpush3.bf16.msra.mxu0 %v455_v8 }
  0x22   : > { %429 = vmatprep.subr.bf16.mxu0 %v472_v0 }
  0x25   : > { %430 = vmatpush3.bf16.msra.mxu0 %v456_v9 }
  0x26   : > { %431 = vmatprep.subr.bf16.mxu0 %v472_v0 }
  0x29   : > { %432 = vmatpush3.bf16.msra.mxu0 %v457_v10 }
  0x2a   : > { %433 = vmatprep.subr.bf16.mxu0 %v472_v0 }
  0x2d   : > { %434 = vmatpush3.bf16.msra.mxu0 %v458_v11 }
  0x30   : > { %436 = vmatmul.mubr.bf16.vlgmr.msra.gmra.mrb[0].mxu0 %v459_v12 }
  0x87   : > { %v195_v13 = vpop.permute.xlu0 %194 }
  0x8b   : > { %v200_v17 = vpop.permute.xlu0 %199 }
 0x103   : > { %v290_v14 = vpop.f32.mrb[0].mxu0 }
 0x104   : > { %v291_v15 = vadd.f32 %v290_v14, %v195_v13  ;;  %v437_v16 = vpop.f32.mrb[1].mxu0 }
 0x105   : > { %v293_v18 = vpop.f32.mrb[2].mxu0 }
 0x106   : > { %v294_v19 = vadd.f32 %v293_v18, %v200_v17  ;;  %v438_v20 = vpop.f32.mrb[3].mxu0  ;;  %v298_v21 = vsel %vm297_vm1, %v291_v15, 0.0 }
 0x107   : > { %299 = vadd.xlane.f32.xlu1 %v298_v21 }
 0x108   : > { %v301_v22 = vsel %vm297_vm1, %v294_v19, 0.0 }
 0x10b   : > { %302 = vadd.xlane.f32.xlu1 %v301_v22 }
 0x194   : > { %v300_v23 = vpop.xlane.xlu1 %299 }
 0x195   : > { %v305_v24 = vmul.f32 0.015625, %v300_v23 }
 0x197   : > { %v307_v25 = vsub.f32 %v291_v15, %v305_v24 }
 0x198   : > { %v303_v26 = vpop.xlane.xlu1 %302 }
 0x199   : > { %v306_v27 = vmul.f32 0.015625, %v303_v26  ;;  %v309_v28 = vmul.f32 %v307_v25, %v307_v25 }
 0x19b   : > { %v308_v29 = vsub.f32 %v294_v19, %v306_v27  ;;  %v311_v30 = vsel %vm297_vm1, %v309_v28, 0.0 }
 0x19c   : > { %312 = vadd.xlane.f32.xlu0 %v311_v30 }
 0x19d   : > { %v310_v31 = vmul.f32 %v308_v29, %v308_v29 }
 0x19f   : > { %v314_v32 = vsel %vm297_vm1, %v310_v31, 0.0 }
 0x1a0   : > { %315 = vadd.xlane.f32.xlu1 %v314_v32 }
 0x229   : > { %v313_v33 = vpop.xlane.xlu0 %312 }
 0x22a   : > { %v317_v34 = vmul.f32 0.015625, %v313_v33 }
 0x22c   : > { %v319_v35 = vadd.f32 1e-05, %v317_v34 }
 0x22d   : > { %v316_v36 = vpop.xlane.xlu1 %315 }
 0x22e   : > { %460 = vrsqrt.f32 %v319_v35  ;;  %v318_v37 = vmul.f32 0.015625, %v316_v36 }
 0x230   : > { %v320_v38 = vadd.f32 1e-05, %v318_v37 }
 0x232   : > { %462 = vrsqrt.f32 %v320_v38 }
 0x238   : > { %v461_v39 = vpop.eup %460 }
 0x239   : > { %v323_v40 = vmul.f32 %v461_v39, %v307_v25 }
 0x23b   : > { %vm325_vm2 = vcmp.ge.f32.partialorder %v323_v40, 0.0  ;;  %v327_v41 = vmul.f32 0.2, %v323_v40 }
 0x23c   : > { %v463_v42 = vpop.eup %462 }
 0x23d   : > { %v329_v43 = vsel %vm325_vm2, %v323_v40, %v327_v41  ;;  %v324_v44 = vmul.f32 %v463_v42, %v308_v29 }
 0x23e   : > { %331 = vst.msk [vmem:[%s170_s27] sm:$0xff] %vm297_vm1, %v329_v43 }
 0x23f   : > { %vm326_vm3 = vcmp.ge.f32.partialorder %v324_v44, 0.0  ;;  %v328_v45 = vmul.f32 0.2, %v324_v44 }
 0x241   : > { %v330_v46 = vsel %vm326_vm3, %v324_v44, %v328_v45 }
 0x242   : > { %332 = vst.msk [vmem:[%s170_s27 + $0x8] sm:$0xff] %vm297_vm1, %v330_v46 }
 0x243 PF: > { %s13_s12 = sadd.s32 1, %s470_s12  }
 0x244   : > { %p10_p4 = scmp.ge.s32.totalorder %s13_s12, 4  }
 0x246   :  { %12 = sbr.rel (!%p10_p4) target bundleno = 1 (0x1), region = 62 }

// kernel: discriminator_forward.7
= control target key start
LH: loop header
LB: loop body
LE: loop exit
PB: predicated region body
PF: predicated region fallthrough
CT: control target
= control target key end

     0   :  { %s669_s12 = smov 0   ;;  %s744_s0 = inlined_call_operand.vmem [shape: bf16[2,256,16], index: 0, kind: input, shape index: {}]   ;;  %s745_s1 = inlined_call_operand.vmem [shape: bf16[32,256], index: 1, kind: input, shape index: {}]   ;;  %s746_s2 = inlined_call_operand.vmem [shape: f32[32,1], index: 2, kind: input, shape index: {}]   ;;  %s747_s3 = inlined_call_operand.vmem [shape: f32[2,32,16], index: 3, kind: output, shape index: {}]  }
   0x1 LB: > { %s522_s13 = sadd.s32 4294967295, %s646_s12   ;;  %p526_p0 = scmp.ge.s32.totalorder %s646_s12, 1  ;;  %s646_s12 = sphi %s669_s12, %s13_s12  }
   0x2   : > { %p137_p1 = scmp.lt.s32.totalorder %s646_s12, 3 }
   0x4   : > { %p138_p2 = pnand %p526_p0, %p137_p1 }
   0x5   : > { %p161_p3 = scmp.lt.s32.totalorder (!%p138_p2), %s522_s13, 1  ;;  %v628_v0 = vld [vmem:[%s745_s1 + $0x4] ss:$8 sps:$4 sm:$0xff] (!%p138_p2)   ;;  %v648_v1 = vmov (!%p138_p2), 0   ;;  %v631_v2 = vld [vmem:[%s745_s1 + $0x14] ss:$8 sps:$4 sm:$0xff] (!%p138_p2)  }
   0x6   : > { %141 = sbr.rel (%p138_p2) target bundleno = 587 (0x24b), region = 32  ;;  %608 = vset.pattern.permute.xlu0 (!%p138_p2), %v648_v1  ;;  %609 = vset.pattern.permute.xlu1 (!%p138_p2), %v648_v1  ;;  %v208_v3 = vld [vmem:[%s746_s2] sm:$0xff] (!%p138_p2)  ;;  %v210_v4 = vld [vmem:[%s746_s2 + $0x10] sm:$0xff] (!%p138_p2)  ;;  %v209_v5 = vld [vmem:[%s746_s2 + $0x8] sm:$0xff] (!%p138_p2)  ;;  %vm397_vm0 = vcmask (!%p138_p2), 130048  }
   0x7   : > { %380 = vmatprep.mubr.bf16.mxu0 (!%p138_p2), %v628_v0  ;;  %214 = vperm.xlu0 (!%p138_p2), %608, %v208_v3   ;;  %v211_v7 = vld [vmem:[%s746_s2 + $0x18] sm:$0xff] (!%p138_p2)  ;;  %v626_v23 = vld [vmem:[%s745_s1] ss:$8 sps:$4 sm:$0xff] (!%p138_p2)  }
   0x8   : > { %388 = vmatprep.mubr.bf16.mxu1 (!%p138_p2), %v631_v2  ;;  %224 = vperm.xlu1 (!%p138_p2), %609, %v210_v4   ;;  %v629_v24 = vld [vmem:[%s745_s1 + $0x10] ss:$8 sps:$4 sm:$0xff] (!%p138_p2)  }
   0xb   : > { %219 = vperm.xlu0 (!%p138_p2), %608, %v209_v5  }
   0xc   : > { %229 = vperm.xlu1 (!%p138_p2), %609, %v211_v7  }
   0xd   : > { %s749_s13 = smov (!%p161_p3, %s522_s13), 1 }
   0xe   : > { %s553_s22 = sshll.u32 %s749_s13, 7  ;;  %s554_s7 = sshll.u32 %s749_s13, 5 }
   0xf   : > { %s698_s27 = scalar_lea.vmem %s744_s0, %s553_s22  ;;  %s170_s10 = scalar_lea.vmem %s747_s3, %s554_s7 }
  0x10   : > { %v610_v6 = vld [vmem:[%s698_s27 + $0x40] sm:$0xff]   ;;  %v612_v9 = vld [vmem:[%s698_s27 + $0x48] sm:$0xff]   ;;  %v614_v11 = vld [vmem:[%s698_s27 + $0x50] sm:$0xff]  }
  0x11   : > { %v611_v8 = vld [vmem:[%s698_s27] sm:$0xff]   ;;  %555 = vmatprep.subr.bf16.mxu0 %v610_v6  ;;  %583 = vmatprep.subr.bf16.mxu1 %v610_v6  ;;  %v613_v10 = vld [vmem:[%s698_s27 + $0x8] sm:$0xff]   ;;  %v615_v12 = vld [vmem:[%s698_s27 + $0x10] sm:$0xff]  }
  0x12   : > { %556 = vmatpush3.bf16.msra.mxu0 %v611_v8  ;;  %591 = vmatpush3.bf16.msra.mxu1 %v611_v8  ;;  %v616_v13 = vld [vmem:[%s698_s27 + $0x58] sm:$0xff]   ;;  %v618_v15 = vld [vmem:[%s698_s27 + $0x60] sm:$0xff]   ;;  %v620_v17 = vld [vmem:[%s698_s27 + $0x68] sm:$0xff]  }
  0x13   : > { %557 = vmatprep.subr.bf16.mxu0 %v612_v9  ;;  %584 = vmatprep.subr.bf16.mxu1 %v612_v9  ;;  %v617_v14 = vld [vmem:[%s698_s27 + $0x18] sm:$0xff]   ;;  %v619_v16 = vld [vmem:[%s698_s27 + $0x20] sm:$0xff]   ;;  %v621_v18 = vld [vmem:[%s698_s27 + $0x28] sm:$0xff]  }
  0x14   : > { %v622_v19 = vld [vmem:[%s698_s27 + $0x70] sm:$0xff]   ;;  %v624_v21 = vld [vmem:[%s698_s27 + $0x78] sm:$0xff]  }
  0x15   : > { %v623_v20 = vld [vmem:[%s698_s27 + $0x30] sm:$0xff]   ;;  %v625_v22 = vld [vmem:[%s698_s27 + $0x38] sm:$0xff]  }
  0x16   : > { %558 = vmatpush3.bf16.msra.mxu0 %v613_v10  ;;  %592 = vmatpush3.bf16.msra.mxu1 %v613_v10 }
  0x17   : > { %559 = vmatprep.subr.bf16.mxu0 %v614_v11  ;;  %585 = vmatprep.subr.bf16.mxu1 %v614_v11 }
  0x1a   : > { %560 = vmatpush3.bf16.msra.mxu0 %v615_v12  ;;  %593 = vmatpush3.bf16.msra.mxu1 %v615_v12 }
  0x1b   : > { %561 = vmatprep.subr.bf16.mxu0 %v616_v13  ;;  %586 = vmatprep.subr.bf16.mxu1 %v616_v13 }
  0x1e   : > { %562 = vmatpush3.bf16.msra.mxu0 %v617_v14  ;;  %594 = vmatpush3.bf16.msra.mxu1 %v617_v14 }
  0x1f   : > { %563 = vmatprep.subr.bf16.mxu0 %v618_v15  ;;  %587 = vmatprep.subr.bf16.mxu1 %v618_v15 }
  0x22   : > { %564 = vmatpush3.bf16.msra.mxu0 %v619_v16  ;;  %595 = vmatpush3.bf16.msra.mxu1 %v619_v16 }
  0x23   : > { %565 = vmatprep.subr.bf16.mxu0 %v620_v17  ;;  %588 = vmatprep.subr.bf16.mxu1 %v620_v17 }
  0x26   : > { %566 = vmatpush3.bf16.msra.mxu0 %v621_v18  ;;  %596 = vmatpush3.bf16.msra.mxu1 %v621_v18 }
  0x27   : > { %567 = vmatprep.subr.bf16.mxu0 %v622_v19  ;;  %589 = vmatprep.subr.bf16.mxu1 %v622_v19 }
  0x2a   : > { %568 = vmatpush3.bf16.msra.mxu0 %v623_v20  ;;  %597 = vmatpush3.bf16.msra.mxu1 %v623_v20 }
  0x2b   : > { %569 = vmatprep.subr.bf16.mxu0 %v624_v21  ;;  %590 = vmatprep.subr.bf16.mxu1 %v624_v21 }
  0x2e   : > { %570 = vmatpush3.bf16.msra.mxu0 %v625_v22  ;;  %598 = vmatpush3.bf16.msra.mxu1 %v625_v22 }
  0x31   : > { %381 = vmatmul.mubr.bf16.vlgmr.msra.gmra.mrb[0].mxu0 %v626_v23  ;;  %389 = vmatmul.mubr.bf16.vlgmr.msra.gmra.mrb[0].mxu1 %v629_v24 }
  0x86   : > { %v215_v25 = vpop.permute.xlu0 %214 }
  0x87   : > { %v225_v26 = vpop.permute.xlu1 %224 }
  0x8a   : > { %v220_v41 = vpop.permute.xlu0 %219 }
  0x8b   : > { %v230_v44 = vpop.permute.xlu1 %229 }
 0x104   : > { %v571_v27 = vpop.f32.mrb[0].mxu0  ;;  %v577_v28 = vpop.f32.mrb[0].mxu1 }
 0x105   : > { %v572_v29 = vpop.f32.mrb[1].mxu0  ;;  %v578_v30 = vpop.f32.mrb[1].mxu1 }
 0x106   : > { %v573_v31 = vadd.f32 %v572_v29, %v571_v27  ;;  %v574_v32 = vpop.f32.mrb[2].mxu0  ;;  %v579_v33 = vadd.f32 %v578_v30, %v577_v28  ;;  %v580_v34 = vpop.f32.mrb[2].mxu1 }
 0x107   : > { %v575_v35 = vpop.f32.mrb[3].mxu0  ;;  %v581_v36 = vpop.f32.mrb[3].mxu1 }
 0x108   : > { %v576_v37 = vadd.f32 %v575_v35, %v574_v32  ;;  %v582_v38 = vadd.f32 %v581_v36, %v580_v34  ;;  %v383_v39 = vadd.f32 %v573_v31, %v215_v25  ;;  %v391_v40 = vadd.f32 %v579_v33, %v225_v26 }
 0x10a   : > { %v398_v42 = vsel %vm397_vm0, %v383_v39, 0.0  ;;  %v386_v43 = vadd.f32 %v576_v37, %v220_v41  ;;  %v404_v46 = vsel %vm397_vm0, %v391_v40, 0.0  ;;  %v394_v47 = vadd.f32 %v582_v38, %v230_v44 }
 0x10b   : > { %399 = vadd.xlane.f32.xlu0 %v398_v42 }
 0x10c   : > { %v401_v45 = vsel %vm397_vm0, %v386_v43, 0.0  ;;  %v407_v48 = vsel %vm397_vm0, %v394_v47, 0.0 }
 0x10d   : > { %402 = vadd.xlane.f32.xlu1 %v401_v45 }
 0x10f   : > { %405 = vadd.xlane.f32.xlu0 %v404_v46 }
 0x113   : > { %408 = vadd.xlane.f32.xlu0 %v407_v48 }
 0x198   : > { %v400_v49 = vpop.xlane.xlu0 %399 }
 0x199   : > { %v411_v50 = vmul.f32 0.0625, %v400_v49 }
 0x19a   : > { %v403_v51 = vpop.xlane.xlu1 %402 }
 0x19b   : > { %v415_v52 = vsub.f32 %v383_v39, %v411_v50  ;;  %v412_v53 = vmul.f32 0.0625, %v403_v51 }
 0x19c   : > { %v406_v54 = vpop.xlane.xlu0 %405 }
 0x19d   : > { %v416_v55 = vsub.f32 %v386_v43, %v412_v53  ;;  %v413_v56 = vmul.f32 0.0625, %v406_v54  ;;  %v419_v57 = vmul.f32 %v415_v52, %v415_v52 }
 0x19f   : > { %v417_v58 = vsub.f32 %v391_v40, %v413_v56  ;;  %v423_v59 = vsel %vm397_vm0, %v419_v57, 0.0  ;;  %v420_v60 = vmul.f32 %v416_v55, %v416_v55 }
 0x1a0   : > { %424 = vadd.xlane.f32.xlu1 %v423_v59  ;;  %v409_v61 = vpop.xlane.xlu0 %408 }
 0x1a1   : > { %v414_v62 = vmul.f32 0.0625, %v409_v61  ;;  %v426_v63 = vsel %vm397_vm0, %v420_v60, 0.0  ;;  %v421_v0 = vmul.f32 %v417_v58, %v417_v58 }
 0x1a2   : > { %427 = vadd.xlane.f32.xlu0 %v426_v63 }
 0x1a3   : > { %v418_v1 = vsub.f32 %v394_v47, %v414_v62  ;;  %v429_v2 = vsel %vm397_vm0, %v421_v0, 0.0 }
 0x1a4   : > { %430 = vadd.xlane.f32.xlu1 %v429_v2 }
 0x1a5   : > { %v422_v3 = vmul.f32 %v418_v1, %v418_v1 }
 0x1a7   : > { %v432_v4 = vsel %vm397_vm0, %v422_v3, 0.0 }
 0x1a8   : > { %433 = vadd.xlane.f32.xlu0 %v432_v4 }
 0x22d   : > { %v425_v5 = vpop.xlane.xlu1 %424 }
 0x22e   : > { %v435_v6 = vmul.f32 0.0625, %v425_v5 }
 0x22f   : > { %v428_v7 = vpop.xlane.xlu0 %427 }
 0x230   : > { %v439_v8 = vadd.f32 1e-05, %v435_v6  ;;  %v436_v9 = vmul.f32 0.0625, %v428_v7 }
 0x231   : > { %v431_v10 = vpop.xlane.xlu1 %430 }
 0x232   : > { %632 = vrsqrt.f32 %v439_v8  ;;  %v440_v11 = vadd.f32 1e-05, %v436_v9  ;;  %v437_v12 = vmul.f32 0.0625, %v431_v10 }
 0x234   : > { %634 = vrsqrt.f32 %v440_v11  ;;  %v441_v13 = vadd.f32 1e-05, %v437_v12 }
 0x235   : > { %v434_v14 = vpop.xlane.xlu0 %433 }
 0x236   : > { %636 = vrsqrt.f32 %v441_v13  ;;  %v438_v15 = vmul.f32 0.0625, %v434_v14 }
 0x238   : > { %v442_v16 = vadd.f32 1e-05, %v438_v15 }
 0x23a   : > { %638 = vrsqrt.f32 %v442_v16 }
 0x23c   : > { %v633_v17 = vpop.eup %632 }
 0x23d   : > { %v447_v18 = vmul.f32 %v633_v17, %v415_v52 }
 0x23e   : > { %v635_v19 = vpop.eup %634 }
 0x23f   : > { %vm451_vm1 = vcmp.ge.f32.partialorder %v447_v18, 0.0  ;;  %v455_v20 = vmul.f32 0.2, %v447_v18  ;;  %v448_v21 = vmul.f32 %v635_v19, %v416_v55 }
 0x240   : > { %v637_v22 = vpop.eup %636 }
 0x241   : > { %v459_v23 = vsel %vm451_vm1, %v447_v18, %v455_v20  ;;  %vm452_vm2 = vcmp.ge.f32.partialorder %v448_v21, 0.0  ;;  %v456_v24 = vmul.f32 0.2, %v448_v21  ;;  %v449_v25 = vmul.f32 %v637_v22, %v417_v58 }
 0x242   : > { %463 = vst.msk [vmem:[%s170_s10] sm:$0xff] %vm397_vm0, %v459_v23 }
 0x243   : > { %v460_v26 = vsel %vm452_vm2, %v448_v21, %v456_v24  ;;  %vm453_vm3 = vcmp.ge.f32.partialorder %v449_v25, 0.0  ;;  %v457_v27 = vmul.f32 0.2, %v449_v25 }
 0x244   : > { %v639_v28 = vpop.eup %638  ;;  %464 = vst.msk [vmem:[%s170_s10 + $0x8] sm:$0xff] %vm397_vm0, %v460_v26 }
 0x245   : > { %v461_v29 = vsel %vm453_vm3, %v449_v25, %v457_v27  ;;  %v450_v30 = vmul.f32 %v639_v28, %v418_v1 }
 0x246   : > { %465 = vst.msk [vmem:[%s170_s10 + $0x10] sm:$0xff] %vm397_vm0, %v461_v29 }
 0x247   : > { %vm454_vm4 = vcmp.ge.f32.partialorder %v450_v30, 0.0  ;;  %v458_v31 = vmul.f32 0.2, %v450_v30 }
 0x249   : > { %v462_v32 = vsel %vm454_vm4, %v450_v30, %v458_v31 }
 0x24a   : > { %466 = vst.msk [vmem:[%s170_s10 + $0x18] sm:$0xff] %vm397_vm0, %v462_v32 }
 0x24b PF: > { %s13_s12 = sadd.s32 1, %s646_s12  }
 0x24c   : > { %p10_p4 = scmp.ge.s32.totalorder %s13_s12, 4  }
 0x24e   :  { %12 = sbr.rel (!%p10_p4) target bundleno = 1 (0x1), region = 62 }

// kernel: discriminator_forward.8
= control target key start
LH: loop header
LB: loop body
LE: loop exit
PB: predicated region body
PF: predicated region fallthrough
CT: control target
= control target key end

     0   :  { %s1148_s12 = smov 0   ;;  %s1360_s0 = inlined_call_operand.vmem [shape: bf16[2,512,9], index: 0, kind: input, shape index: {}]   ;;  %s1361_s1 = inlined_call_operand.vmem [shape: bf16[64,512], index: 1, kind: input, shape index: {}]   ;;  %s1362_s2 = inlined_call_operand.vmem [shape: f32[64,1], index: 2, kind: input, shape index: {}]   ;;  %s1363_s3 = inlined_call_operand.vmem [shape: f32[2,64,9], index: 3, kind: output, shape index: {}]  }
   0x1 LB: > { %s895_s13 = sadd.s32 4294967295, %s1125_s12   ;;  %p899_p0 = scmp.ge.s32.totalorder %s1125_s12, 1  ;;  %s1125_s12 = sphi %s1148_s12, %s13_s12  }
   0x2   : > { %p137_p1 = scmp.lt.s32.totalorder %s1125_s12, 3 }
   0x4   : > { %p138_p2 = pnand %p899_p0, %p137_p1 }
   0x5   : > { %p161_p3 = scmp.lt.s32.totalorder (!%p138_p2), %s895_s13, 1  ;;  %v1081_v0 = vld [vmem:[%s1361_s1 + $0x4] ss:$16 sps:$4 sm:$0xff] (!%p138_p2)   ;;  %v1127_v1 = vmov (!%p138_p2), 0   ;;  %v1084_v2 = vld [vmem:[%s1361_s1 + $0xc] ss:$16 sps:$4 sm:$0xff] (!%p138_p2)  }
   0x6   : > { %141 = sbr.rel (%p138_p2) target bundleno = 608 (0x260), region = 32  ;;  %1045 = vset.pattern.permute.xlu0 (!%p138_p2), %v1127_v1  ;;  %1046 = vset.pattern.permute.xlu1 (!%p138_p2), %v1127_v1  ;;  %v1079_v33 = vld [vmem:[%s1361_s1] ss:$16 sps:$4 sm:$0xff] (!%p138_p2)   ;;  %v1082_v35 = vld [vmem:[%s1361_s1 + $0x8] ss:$16 sps:$4 sm:$0xff] (!%p138_p2)   ;;  %vm702_vm0 = vcmask (!%p138_p2), 72704  }
   0x7   : > { %604 = vmatprep.mubr.bf16.mxu0 (!%p138_p2), %v1081_v0  ;;  %669 = vmatprep.mubr.bf16.mxu1 (!%p138_p2), %v1084_v2  ;;  %v1085_v37 = vld [vmem:[%s1361_s1 + $0x24] ss:$16 sps:$4 sm:$0xff] (!%p138_p2)   ;;  %v1087_v38 = vld [vmem:[%s1361_s1 + $0x2c] ss:$16 sps:$4 sm:$0xff] (!%p138_p2)   ;;  %v1089_v42 = vld [vmem:[%s1361_s1 + $0x20] ss:$16 sps:$4 sm:$0xff] (!%p138_p2)  }
   0x8   : > { %v252_v39 = vld [vmem:[%s1362_s2] sm:$0xff] (!%p138_p2)  ;;  %v254_v40 = vld [vmem:[%s1362_s2 + $0x10] sm:$0xff] (!%p138_p2)  ;;  %v253_v41 = vld [vmem:[%s1362_s2 + $0x8] sm:$0xff] (!%p138_p2) }
   0x9   : > { %262 = vperm.xlu0 (!%p138_p2), %1045, %v252_v39   ;;  %272 = vperm.xlu1 (!%p138_p2), %1046, %v254_v40   ;;  %v255_v43 = vld [vmem:[%s1362_s2 + $0x18] sm:$0xff] (!%p138_p2)  ;;  %v1091_v45 = vld [vmem:[%s1361_s1 + $0x44] ss:$16 sps:$4 sm:$0xff] (!%p138_p2)   ;;  %v257_v48 = vld [vmem:[%s1362_s2 + $0x28] sm:$0xff] (!%p138_p2) }
   0xa   : > { %v1090_v44 = vld [vmem:[%s1361_s1 + $0x28] ss:$16 sps:$4 sm:$0xff] (!%p138_p2)   ;;  %v1093_v46 = vld [vmem:[%s1361_s1 + $0x4c] ss:$16 sps:$4 sm:$0xff] (!%p138_p2)   ;;  %v256_v47 = vld [vmem:[%s1362_s2 + $0x20] sm:$0xff] (!%p138_p2) }
   0xb   : > { %v258_v49 = vld [vmem:[%s1362_s2 + $0x30] sm:$0xff] (!%p138_p2)  ;;  %v259_v51 = vld [vmem:[%s1362_s2 + $0x38] sm:$0xff] (!%p138_p2) }
   0xc   : > { %v1095_v50 = vld [vmem:[%s1361_s1 + $0x40] ss:$16 sps:$4 sm:$0xff] (!%p138_p2)   ;;  %v1096_v52 = vld [vmem:[%s1361_s1 + $0x48] ss:$16 sps:$4 sm:$0xff] (!%p138_p2)   ;;  %v1097_v53 = vld [vmem:[%s1361_s1 + $0x64] ss:$16 sps:$4 sm:$0xff] (!%p138_p2)  }
   0xd   : > { %s1365_s13 = smov (!%p161_p3, %s895_s13), 1  ;;  %267 = vperm.xlu0 %1045, %v253_v41   ;;  %277 = vperm.xlu1 %1046, %v255_v43   ;;  %v1099_v54 = vld [vmem:[%s1361_s1 + $0x6c] ss:$16 sps:$4 sm:$0xff]   ;;  %v1101_v55 = vld [vmem:[%s1361_s1 + $0x60] ss:$16 sps:$4 sm:$0xff]  }
   0xe   : > { %s954_s18 = sshll.u32 %s1365_s13, 8  ;;  %v1102_v56 = vld [vmem:[%s1361_s1 + $0x68] ss:$16 sps:$4 sm:$0xff]   ;;  %s955_s16 = sshll.u32 %s1365_s13, 6 }
   0xf   : > { %s1168_s21 = scalar_lea.vmem %s1360_s0, %s954_s18  ;;  %s1332_s19 = scalar_lea.vmem %s1363_s3, %s955_s16 }
  0x10   : > { %v1047_v3 = vld [vmem:[%s1168_s21 + $0x40] sm:$0xff]   ;;  %v1051_v7 = vld [vmem:[%s1168_s21 + $0x48] sm:$0xff]   ;;  %v1055_v11 = vld [vmem:[%s1168_s21 + $0x50] sm:$0xff]  }
  0x11   : > { %v1048_v4 = vld [vmem:[%s1168_s21 + $0xc0] sm:$0xff]   ;;  %956 = vmatprep.subr.bf16.mxu0 %v1047_v3  ;;  %v1052_v8 = vld [vmem:[%s1168_s21 + $0xc8] sm:$0xff]   ;;  %v1056_v12 = vld [vmem:[%s1168_s21 + $0xd0] sm:$0xff]   ;;  %282 = vperm.xlu0 %1045, %v256_v47  }
  0x12   : > { %v1049_v5 = vld [vmem:[%s1168_s21] sm:$0xff]   ;;  %996 = vmatprep.subr.bf16.mxu1 %v1048_v4  ;;  %v1053_v9 = vld [vmem:[%s1168_s21 + $0x8] sm:$0xff]   ;;  %v1057_v13 = vld [vmem:[%s1168_s21 + $0x10] sm:$0xff]   ;;  %287 = vperm.xlu1 %1046, %v257_v48  }
  0x13   : > { %v1050_v6 = vld [vmem:[%s1168_s21 + $0x80] sm:$0xff]   ;;  %957 = vmatpush3.bf16.msra.mxu0 %v1049_v5  ;;  %v1054_v10 = vld [vmem:[%s1168_s21 + $0x88] sm:$0xff]   ;;  %v1058_v14 = vld [vmem:[%s1168_s21 + $0x90] sm:$0xff]  }
  0x14   : > { %997 = vmatpush3.bf16.msra.mxu1 %v1050_v6  ;;  %958 = vmatprep.subr.bf16.mxu0 %v1051_v7  ;;  %v1059_v15 = vld [vmem:[%s1168_s21 + $0x58] sm:$0xff]   ;;  %v1063_v19 = vld [vmem:[%s1168_s21 + $0x60] sm:$0xff]   ;;  %v1067_v23 = vld [vmem:[%s1168_s21 + $0x68] sm:$0xff]  }
  0x15   : > { %998 = vmatprep.subr.bf16.mxu1 %v1052_v8  ;;  %v1060_v16 = vld [vmem:[%s1168_s21 + $0xd8] sm:$0xff]   ;;  %v1064_v20 = vld [vmem:[%s1168_s21 + $0xe0] sm:$0xff]   ;;  %v1068_v24 = vld [vmem:[%s1168_s21 + $0xe8] sm:$0xff]   ;;  %292 = vperm.xlu0 %1045, %v258_v49  }
  0x16   : > { %v1061_v17 = vld [vmem:[%s1168_s21 + $0x18] sm:$0xff]   ;;  %v1065_v21 = vld [vmem:[%s1168_s21 + $0x20] sm:$0xff]   ;;  %v1069_v25 = vld [vmem:[%s1168_s21 + $0x28] sm:$0xff]   ;;  %297 = vperm.xlu1 %1046, %v259_v51  }
  0x17   : > { %959 = vmatpush3.bf16.msra.mxu0 %v1053_v9  ;;  %v1062_v18 = vld [vmem:[%s1168_s21 + $0x98] sm:$0xff]   ;;  %v1066_v22 = vld [vmem:[%s1168_s21 + $0xa0] sm:$0xff]   ;;  %v1070_v26 = vld [vmem:[%s1168_s21 + $0xa8] sm:$0xff]  }
  0x18   : > { %999 = vmatpush3.bf16.msra.mxu1 %v1054_v10  ;;  %960 = vmatprep.subr.bf16.mxu0 %v1055_v11  ;;  %v1071_v27 = vld [vmem:[%s1168_s21 + $0x70] sm:$0xff]   ;;  %v1075_v31 = vld [vmem:[%s1168_s21 + $0x78] sm:$0xff]  }
  0x19   : > { %1000 = vmatprep.subr.bf16.mxu1 %v1056_v12  ;;  %v1072_v28 = vld [vmem:[%s1168_s21 + $0xf0] sm:$0xff]   ;;  %v1076_v32 = vld [vmem:[%s1168_s21 + $0xf8] sm:$0xff]  }
  0x1a   : > { %v1073_v29 = vld [vmem:[%s1168_s21 + $0x30] sm:$0xff]   ;;  %v1077_v34 = vld [vmem:[%s1168_s21 + $0x38] sm:$0xff]  }
  0x1b   : > { %961 = vmatpush3.bf16.msra.mxu0 %v1057_v13  ;;  %v1074_v30 = vld [vmem:[%s1168_s21 + $0xb0] sm:$0xff]   ;;  %v1078_v36 = vld [vmem:[%s1168_s21 + $0xb8] sm:$0xff]  }
  0x1c   : > { %1001 = vmatpush3.bf16.msra.mxu1 %v1058_v14  ;;  %962 = vmatprep.subr.bf16.mxu0 %v1059_v15 }
  0x1d   : > { %1002 = vmatprep.subr.bf16.mxu1 %v1060_v16 }
  0x1f   : > { %963 = vmatpush3.bf16.msra.mxu0 %v1061_v17 }
  0x20   : > { %1003 = vmatpush3.bf16.msra.mxu1 %v1062_v18  ;;  %964 = vmatprep.subr.bf16.mxu0 %v1063_v19 }
  0x21   : > { %1004 = vmatprep.subr.bf16.mxu1 %v1064_v20 }
  0x23   : > { %965 = vmatpush3.bf16.msra.mxu0 %v1065_v21 }
  0x24   : > { %1005 = vmatpush3.bf16.msra.mxu1 %v1066_v22  ;;  %966 = vmatprep.subr.bf16.mxu0 %v1067_v23 }
  0x25   : > { %1006 = vmatprep.subr.bf16.mxu1 %v1068_v24 }
  0x27   : > { %967 = vmatpush3.bf16.msra.mxu0 %v1069_v25 }
  0x28   : > { %1007 = vmatpush3.bf16.msra.mxu1 %v1070_v26  ;;  %968 = vmatprep.subr.bf16.mxu0 %v1071_v27 }
  0x29   : > { %1008 = vmatprep.subr.bf16.mxu1 %v1072_v28 }
  0x2b   : > { %969 = vmatpush3.bf16.msra.mxu0 %v1073_v29 }
  0x2c   : > { %1009 = vmatpush3.bf16.msra.mxu1 %v1074_v30  ;;  %970 = vmatprep.subr.bf16.mxu0 %v1075_v31 }
  0x2d   : > { %1010 = vmatprep.subr.bf16.mxu1 %v1076_v32 }
  0x2f   : > { %971 = vmatpush3.bf16.msra.mxu0 %v1077_v34 }
  0x30   : > { %1011 = vmatpush3.bf16.msra.mxu1 %v1078_v36 }
  0x32   : > { %605 = vmatmul.mubr.bf16.vlgmr.msra.gmra.mrb[0].mxu0 %v1079_v33 }
  0x33   : > { %670 = vmatmul.mubr.bf16.vlgmr.msra.gmra.mrb[0].mxu1 %v1082_v35  ;;  %612 = vmatprep.mubr.bf16.mxu0 %v1085_v37 }
  0x34   : > { %677 = vmatprep.mubr.bf16.mxu1 %v1087_v38 }
  0x3a   : > { %613 = vmatmul.mubr.bf16.gmra.mrb[4].mxu0 %v1089_v42 }
  0x3b   : > { %678 = vmatmul.mubr.bf16.gmra.mrb[4].mxu1 %v1090_v44  ;;  %620 = vmatprep.mubr.bf16.mxu0 %v1091_v45 }
  0x3c   : > { %685 = vmatprep.mubr.bf16.mxu1 %v1093_v46 }
  0x42   : > { %621 = vmatmul.mubr.bf16.gmra.mrb[8].mxu0 %v1095_v50 }
  0x43   : > { %686 = vmatmul.mubr.bf16.gmra.mrb[8].mxu1 %v1096_v52  ;;  %628 = vmatprep.mubr.bf16.mxu0 %v1097_v53 }
  0x44   : > { %693 = vmatprep.mubr.bf16.mxu1 %v1099_v54 }
  0x4a   : > { %629 = vmatmul.mubr.bf16.gmra.mrb[12].mxu0 %v1101_v55 }
  0x4b   : > { %694 = vmatmul.mubr.bf16.gmra.mrb[12].mxu1 %v1102_v56 }
  0x88   : > { %v263_v57 = vpop.permute.xlu0 %262  ;;  %v273_v10 = vpop.permute.xlu1 %272 }
  0x8c   : > { %v268_v59 = vpop.permute.xlu0 %267  ;;  %v278_v26 = vpop.permute.xlu1 %277 }
  0x90   : > { %v283_v30 = vpop.permute.xlu0 %282 }
  0x91   : > { %v288_v46 = vpop.permute.xlu1 %287 }
  0x94   : > { %v293_v50 = vpop.permute.xlu0 %292 }
 0x105   : > { %v972_v58 = vpop.f32.mrb[0].mxu0 }
 0x106   : > { %v1012_v60 = vpop.f32.mrb[0].mxu1  ;;  %v973_v61 = vpop.f32.mrb[1].mxu0 }
 0x107   : > { %v974_v62 = vadd.f32 %v973_v61, %v972_v58  ;;  %v1013_v63 = vpop.f32.mrb[1].mxu1  ;;  %v975_v0 = vpop.f32.mrb[2].mxu0 }
 0x108   : > { %v1014_v1 = vadd.f32 %v1013_v63, %v1012_v60  ;;  %v1015_v2 = vpop.f32.mrb[2].mxu1  ;;  %v976_v3 = vpop.f32.mrb[3].mxu0 }
 0x109   : > { %v607_v4 = vadd.f32 %v974_v62, %v263_v57  ;;  %v977_v5 = vadd.f32 %v976_v3, %v975_v0  ;;  %v1016_v6 = vpop.f32.mrb[3].mxu1 }
 0x10a   : > { %v1017_v7 = vadd.f32 %v1016_v6, %v1015_v2  ;;  %v298_v2 = vpop.permute.xlu1 %297 }
 0x10b   : > { %v610_v8 = vadd.f32 %v977_v5, %v268_v59  ;;  %v1268_v9 = vadd.f32 %v1014_v1, %v607_v4 }
 0x10d   : > { %v978_v11 = vpop.f32.mrb[4].mxu0  ;;  %v703_v12 = vsel %vm702_vm0, %v1268_v9, 0.0  ;;  %v1272_v13 = vadd.f32 %v1017_v7, %v610_v8 }
 0x10e   : > { %v1018_v14 = vpop.f32.mrb[4].mxu1  ;;  %v979_v15 = vpop.f32.mrb[5].mxu0  ;;  %704 = vadd.xlane.f32.xlu0 %v703_v12 }
 0x10f   : > { %v980_v16 = vadd.f32 %v979_v15, %v978_v11  ;;  %v1019_v17 = vpop.f32.mrb[5].mxu1  ;;  %v981_v18 = vpop.f32.mrb[6].mxu0  ;;  %v706_v19 = vsel %vm702_vm0, %v1272_v13, 0.0 }
 0x110   : > { %v1020_v20 = vadd.f32 %v1019_v17, %v1018_v14  ;;  %v1021_v21 = vpop.f32.mrb[6].mxu1  ;;  %v982_v22 = vpop.f32.mrb[7].mxu0  ;;  %707 = vadd.xlane.f32.xlu1 %v706_v19 }
 0x111   : > { %v615_v23 = vadd.f32 %v980_v16, %v273_v10  ;;  %v983_v24 = vadd.f32 %v982_v22, %v981_v18  ;;  %v1022_v25 = vpop.f32.mrb[7].mxu1 }
 0x112   : > { %v1023_v27 = vadd.f32 %v1022_v25, %v1021_v21 }
 0x113   : > { %v618_v28 = vadd.f32 %v983_v24, %v278_v26  ;;  %v1276_v29 = vadd.f32 %v1020_v20, %v615_v23 }
 0x115   : > { %v984_v31 = vpop.f32.mrb[8].mxu0  ;;  %v709_v32 = vsel %vm702_vm0, %v1276_v29, 0.0  ;;  %v1280_v33 = vadd.f32 %v1023_v27, %v618_v28 }
 0x116   : > { %v1024_v34 = vpop.f32.mrb[8].mxu1  ;;  %v985_v35 = vpop.f32.mrb[9].mxu0  ;;  %710 = vadd.xlane.f32.xlu0 %v709_v32 }
 0x117   : > { %v986_v36 = vadd.f32 %v985_v35, %v984_v31  ;;  %v1025_v37 = vpop.f32.mrb[9].mxu1  ;;  %v987_v38 = vpop.f32.mrb[10].mxu0  ;;  %v712_v45 = vsel %vm702_vm0, %v1280_v33, 0.0 }
 0x118   : > { %v1026_v39 = vadd.f32 %v1025_v37, %v1024_v34  ;;  %v1027_v40 = vpop.f32.mrb[10].mxu1  ;;  %v988_v41 = vpop.f32.mrb[11].mxu0 }
 0x119   : > { %v623_v42 = vadd.f32 %v986_v36, %v283_v30  ;;  %v989_v43 = vadd.f32 %v988_v41, %v987_v38  ;;  %v1028_v44 = vpop.f32.mrb[11].mxu1 }
 0x11a   : > { %v1029_v47 = vadd.f32 %v1028_v44, %v1027_v40  ;;  %713 = vadd.xlane.f32.xlu0 %v712_v45 }
 0x11b   : > { %v626_v48 = vadd.f32 %v989_v43, %v288_v46  ;;  %v688_v49 = vadd.f32 %v1026_v39, %v623_v42 }
 0x11d   : > { %v990_v51 = vpop.f32.mrb[12].mxu0  ;;  %v715_v52 = vsel %vm702_vm0, %v688_v49, 0.0  ;;  %v691_v53 = vadd.f32 %v1029_v47, %v626_v48 }
 0x11e   : > { %v1030_v54 = vpop.f32.mrb[12].mxu1  ;;  %v991_v55 = vpop.f32.mrb[13].mxu0  ;;  %716 = vadd.xlane.f32.xlu1 %v715_v52 }
 0x11f   : > { %v992_v56 = vadd.f32 %v991_v55, %v990_v51  ;;  %v1031_v57 = vpop.f32.mrb[13].mxu1  ;;  %v993_v58 = vpop.f32.mrb[14].mxu0  ;;  %v718_v59 = vsel %vm702_vm0, %v691_v53, 0.0 }
 0x120   : > { %v1032_v60 = vadd.f32 %v1031_v57, %v1030_v54  ;;  %v1033_v61 = vpop.f32.mrb[14].mxu1  ;;  %v994_v62 = vpop.f32.mrb[15].mxu0  ;;  %719 = vadd.xlane.f32.xlu0 %v718_v59 }
 0x121   : > { %v631_v63 = vadd.f32 %v992_v56, %v293_v50  ;;  %v995_v0 = vadd.f32 %v994_v62, %v993_v58  ;;  %v1034_v1 = vpop.f32.mrb[15].mxu1 }
 0x122   : > { %v1035_v3 = vadd.f32 %v1034_v1, %v1033_v61 }
 0x123   : > { %v634_v4 = vadd.f32 %v995_v0, %v298_v2  ;;  %v696_v5 = vadd.f32 %v1032_v60, %v631_v63 }
 0x125   : > { %v721_v6 = vsel %vm702_vm0, %v696_v5, 0.0  ;;  %v699_v7 = vadd.f32 %v1035_v3, %v634_v4 }
 0x126   : > { %722 = vadd.xlane.f32.xlu1 %v721_v6 }
 0x127   : > { %v724_v8 = vsel %vm702_vm0, %v699_v7, 0.0 }
 0x128   : > { %725 = vadd.xlane.f32.xlu0 %v724_v8 }
 0x19b   : > { %v705_v10 = vpop.xlane.xlu0 %704 }
 0x19c   : > { %v728_v11 = vmul.f32 0.11111111, %v705_v10 }
 0x19d   : > { %v708_v12 = vpop.xlane.xlu1 %707 }
 0x19e   : > { %v736_v14 = vsub.f32 %v1268_v9, %v728_v11  ;;  %v729_v15 = vmul.f32 0.11111111, %v708_v12 }
 0x1a0   : > { %v1290_v16 = vsub.f32 %v1272_v13, %v729_v15  ;;  %v744_v17 = vmul.f32 %v736_v14, %v736_v14 }
 0x1a2   : > { %v752_v18 = vsel %vm702_vm0, %v744_v17, 0.0  ;;  %v745_v19 = vmul.f32 %v1290_v16, %v1290_v16 }
 0x1a3   : > { %753 = vadd.xlane.f32.xlu1 %v752_v18  ;;  %v711_v20 = vpop.xlane.xlu0 %710 }
 0x1a4   : > { %v730_v21 = vmul.f32 0.11111111, %v711_v20  ;;  %v755_v22 = vsel %vm702_vm0, %v745_v19, 0.0 }
 0x1a5   : > { %756 = vadd.xlane.f32.xlu0 %v755_v22 }
 0x1a6   : > { %v1297_v23 = vsub.f32 %v1276_v29, %v730_v21 }
 0x1a7   : > { %v714_v9 = vpop.xlane.xlu0 %713 }
 0x1a8   : > { %v731_v24 = vmul.f32 0.11111111, %v714_v9  ;;  %v746_v13 = vmul.f32 %v1297_v23, %v1297_v23 }
 0x1aa   : > { %v1302_v25 = vsub.f32 %v1280_v33, %v731_v24  ;;  %v758_v26 = vsel %vm702_vm0, %v746_v13, 0.0 }
 0x1ab   : > { %v717_v27 = vpop.xlane.xlu1 %716  ;;  %759 = vadd.xlane.f32.xlu1 %v758_v26 }
 0x1ac   : > { %v732_v28 = vmul.f32 0.11111111, %v717_v27  ;;  %v747_v30 = vmul.f32 %v1302_v25, %v1302_v25 }
 0x1ad   : > { %v720_v31 = vpop.xlane.xlu0 %719 }
 0x1ae   : > { %v1307_v32 = vsub.f32 %v688_v49, %v732_v28  ;;  %v733_v29 = vmul.f32 0.11111111, %v720_v31  ;;  %v761_v34 = vsel %vm702_vm0, %v747_v30, 0.0 }
 0x1af   : > { %762 = vadd.xlane.f32.xlu0 %v761_v34 }
 0x1b0   : > { %v1310_v35 = vsub.f32 %v691_v53, %v733_v29  ;;  %v748_v33 = vmul.f32 %v1307_v32, %v1307_v32 }
 0x1b2   : > { %v764_v36 = vsel %vm702_vm0, %v748_v33, 0.0  ;;  %v749_v37 = vmul.f32 %v1310_v35, %v1310_v35 }
 0x1b3   : > { %v723_v38 = vpop.xlane.xlu1 %722  ;;  %765 = vadd.xlane.f32.xlu1 %v764_v36 }
 0x1b4   : > { %v734_v39 = vmul.f32 0.11111111, %v723_v38  ;;  %v767_v40 = vsel %vm702_vm0, %v749_v37, 0.0 }
 0x1b5   : > { %768 = vadd.xlane.f32.xlu0 %v767_v40  ;;  %v726_v41 = vpop.xlane.xlu0 %725 }
 0x1b6   : > { %v1318_v42 = vsub.f32 %v696_v5, %v734_v39  ;;  %v735_v43 = vmul.f32 0.11111111, %v726_v41 }
 0x1b8   : > { %v1320_v44 = vsub.f32 %v699_v7, %v735_v43  ;;  %v750_v45 = vmul.f32 %v1318_v42, %v1318_v42 }
 0x1ba   : > { %v770_v46 = vsel %vm702_vm0, %v750_v45, 0.0  ;;  %v751_v47 = vmul.f32 %v1320_v44, %v1320_v44 }
 0x1bb   : > { %771 = vadd.xlane.f32.xlu1 %v770_v46 }
 0x1bc   : > { %v773_v48 = vsel %vm702_vm0, %v751_v47, 0.0 }
 0x1bd   : > { %774 = vadd.xlane.f32.xlu0 %v773_v48 }
 0x230   : > { %v754_v49 = vpop.xlane.xlu1 %753 }
 0x231   : > { %v776_v50 = vmul.f32 0.11111111, %v754_v49 }
 0x232   : > { %v757_v51 = vpop.xlane.xlu0 %756 }
 0x233   : > { %v784_v52 = vadd.f32 1e-05, %v776_v50  ;;  %v777_v53 = vmul.f32 0.11111111, %v757_v51 }
 0x235   : > { %1103 = vrsqrt.f32 %v784_v52  ;;  %v785_v54 = vadd.f32 1e-05, %v777_v53 }
 0x237   : > { %1105 = vrsqrt.f32 %v785_v54 }
 0x238   : > { %v760_v55 = vpop.xlane.xlu1 %759 }
 0x239   : > { %v778_v56 = vmul.f32 0.11111111, %v760_v55 }
 0x23b   : > { %v786_v57 = vadd.f32 1e-05, %v778_v56 }
 0x23c   : > { %v763_v58 = vpop.xlane.xlu0 %762 }
 0x23d   : > { %1107 = vrsqrt.f32 %v786_v57  ;;  %v779_v59 = vmul.f32 0.11111111, %v763_v58 }
 0x23f   : > { %v1104_v60 = vpop.eup %1103  ;;  %v787_v61 = vadd.f32 1e-05, %v779_v59 }
 0x240   : > { %v800_v62 = vmul.f32 %v1104_v60, %v736_v14  ;;  %v766_v63 = vpop.xlane.xlu1 %765 }
 0x241   : > { %v1106_v0 = vpop.eup %1105  ;;  %1109 = vrsqrt.f32 %v787_v61  ;;  %v780_v1 = vmul.f32 0.11111111, %v766_v63 }
 0x242   : > { %vm808_vm1 = vcmp.ge.f32.partialorder %v800_v62, 0.0  ;;  %v816_v2 = vmul.f32 0.2, %v800_v62  ;;  %v801_v3 = vmul.f32 %v1106_v0, %v1290_v16  ;;  %v769_v4 = vpop.xlane.xlu0 %768 }
 0x243   : > { %v788_v5 = vadd.f32 1e-05, %v780_v1  ;;  %v781_v6 = vmul.f32 0.11111111, %v769_v4 }
 0x244   : > { %v824_v7 = vsel %vm808_vm1, %v800_v62, %v816_v2  ;;  %vm809_vm2 = vcmp.ge.f32.partialorder %v801_v3, 0.0  ;;  %v817_v8 = vmul.f32 0.2, %v801_v3 }
 0x245   : > { %832 = vst.msk [vmem:[%s1332_s19] sm:$0xff] %vm702_vm0, %v824_v7  ;;  %1111 = vrsqrt.f32 %v788_v5  ;;  %v789_v10 = vadd.f32 1e-05, %v781_v6 }
 0x246   : > { %v825_v11 = vsel %vm809_vm2, %v801_v3, %v817_v8 }
 0x247   : > { %v1108_v12 = vpop.eup %1107  ;;  %833 = vst.msk [vmem:[%s1332_s19 + $0x8] sm:$0xff] %vm702_vm0, %v825_v11  ;;  %1113 = vrsqrt.f32 %v789_v10 }
 0x248   : > { %v802_v14 = vmul.f32 %v1108_v12, %v1297_v23  ;;  %v772_v15 = vpop.xlane.xlu1 %771 }
 0x249   : > { %v782_v16 = vmul.f32 0.11111111, %v772_v15 }
 0x24a   : > { %vm810_vm3 = vcmp.ge.f32.partialorder %v802_v14, 0.0  ;;  %v818_v17 = vmul.f32 0.2, %v802_v14  ;;  %v775_v18 = vpop.xlane.xlu0 %774 }
 0x24b   : > { %v1110_v19 = vpop.eup %1109  ;;  %v790_v20 = vadd.f32 1e-05, %v782_v16  ;;  %v783_v21 = vmul.f32 0.11111111, %v775_v18 }
 0x24c   : > { %v826_v22 = vsel %vm810_vm3, %v802_v14, %v818_v17  ;;  %v803_v9 = vmul.f32 %v1110_v19, %v1302_v25 }
 0x24d   : > { %834 = vst.msk [vmem:[%s1332_s19 + $0x10] sm:$0xff] %vm702_vm0, %v826_v22  ;;  %1115 = vrsqrt.f32 %v790_v20  ;;  %v791_v24 = vadd.f32 1e-05, %v783_v21 }
 0x24e   : > { %vm811_vm4 = vcmp.ge.f32.partialorder %v803_v9, 0.0  ;;  %v819_v13 = vmul.f32 0.2, %v803_v9 }
 0x24f   : > { %v1112_v23 = vpop.eup %1111  ;;  %1117 = vrsqrt.f32 %v791_v24 }
 0x250   : > { %v827_v26 = vsel %vm811_vm4, %v803_v9, %v819_v13  ;;  %v804_v27 = vmul.f32 %v1112_v23, %v1307_v32 }
 0x251   : > { %v1114_v28 = vpop.eup %1113  ;;  %835 = vst.msk [vmem:[%s1332_s19 + $0x18] sm:$0xff] %vm702_vm0, %v827_v26 }
 0x252   : > { %vm812_vm5 = vcmp.ge.f32.partialorder %v804_v27, 0.0  ;;  %v820_v30 = vmul.f32 0.2, %v804_v27  ;;  %v805_v25 = vmul.f32 %v1114_v28, %v1310_v35 }
 0x254   : > { %v828_v31 = vsel %vm812_vm5, %v804_v27, %v820_v30  ;;  %vm813_vm6 = vcmp.ge.f32.partialorder %v805_v25, 0.0  ;;  %v821_v29 = vmul.f32 0.2, %v805_v25 }
 0x255   : > { %836 = vst.msk [vmem:[%s1332_s19 + $0x20] sm:$0xff] %vm702_vm0, %v828_v31 }
 0x256   : > { %v829_v34 = vsel %vm813_vm6, %v805_v25, %v821_v29 }
 0x257   : > { %v1116_v33 = vpop.eup %1115  ;;  %837 = vst.msk [vmem:[%s1332_s19 + $0x28] sm:$0xff] %vm702_vm0, %v829_v34 }
 0x258   : > { %v806_v32 = vmul.f32 %v1116_v33, %v1318_v42 }
 0x259   : > { %v1118_v36 = vpop.eup %1117 }
 0x25a   : > { %vm814_vm7 = vcmp.ge.f32.partialorder %v806_v32, 0.0  ;;  %v822_v37 = vmul.f32 0.2, %v806_v32  ;;  %v807_v38 = vmul.f32 %v1118_v36, %v1320_v44 }
 0x25c   : > { %v830_v39 = vsel %vm814_vm7, %v806_v32, %v822_v37  ;;  %vm815_vm8 = vcmp.ge.f32.partialorder %v807_v38, 0.0  ;;  %v823_v35 = vmul.f32 0.2, %v807_v38 }
 0x25d   : > { %838 = vst.msk [vmem:[%s1332_s19 + $0x30] sm:$0xff] %vm702_vm0, %v830_v39 }
 0x25e   : > { %v831_v40 = vsel %vm815_vm8, %v807_v38, %v823_v35 }
 0x25f   : > { %839 = vst.msk [vmem:[%s1332_s19 + $0x38] sm:$0xff] %vm702_vm0, %v831_v40 }
 0x260 PF: > { %s13_s12 = sadd.s32 1, %s1125_s12  }
 0x261   : > { %p10_p4 = scmp.ge.s32.totalorder %s13_s12, 4  }
 0x263   :  { %12 = sbr.rel (!%p10_p4) target bundleno = 1 (0x1), region = 62 }

// kernel: discriminator_forward.9
= control target key start
LH: loop header
LB: loop body
LE: loop exit
PB: predicated region body
PF: predicated region fallthrough
CT: control target
= control target key end

     0   :  { %s1231_s14 = smov 0   ;;  %s1343_s0 = inlined_call_operand.vmem [shape: bf16[2,1024,4], index: 0, kind: input, shape index: {}]   ;;  %s1344_s1 = inlined_call_operand.vmem [shape: bf16[1,1024], index: 1, kind: input, shape index: {}]   ;;  %s1345_s2 = inlined_call_operand.<no memory space> [shape: f32[1,1], index: 2, kind: input, shape index: {}]   ;;  %s1346_s3 = inlined_call_operand.vmem [shape: f32[2,1,4], index: 3, kind: output, shape index: {}]  }
   0x1   :  { %v8_v0 = vstv %s1345_s2 }
   0x2   :  { %9 = vst [vmem:[#allocation2] sm:$0x1] %v8_v0 }
   0x3 LB: > { %s960_s15 = sadd.s32 4294967295, %s1204_s14   ;;  %p964_p0 = scmp.ge.s32.totalorder %s1204_s14, 1  ;;  %s1204_s14 = sphi %s1231_s14, %s15_s14  }
   0x4   : > { %p139_p1 = scmp.lt.s32.totalorder %s1204_s14, 3 }
   0x6   : > { %p140_p2 = pnand %p964_p0, %p139_p1 }
   0x7   : > { %p161_p3 = scmp.lt.s32.totalorder (!%p140_p2), %s960_s15, 1  ;;  %v305_v1 = vlaneseq (!%p140_p2)  ;;  %v1206_v2 = vmov (!%p140_p2), 1966171168   ;;  %v1207_v4 = vmov (!%p140_p2), 0   ;;  %v170_v8 = vld [vmem:[%s1344_s1] sm:$0xff] (!%p140_p2)  ;;  %vm911_vm0 = vcmask (!%p140_p2), 24576  }
   0x8   : > { %143 = sbr.rel (%p140_p2) target bundleno = 304 (0x130), region = 32  ;;  %v312_v3 = vunpack.c.l.s4 (!%p140_p2), %v1206_v2  ;;  %1132 = vset.pattern.permute.xlu0 (!%p140_p2), %v1207_v4  ;;  %v310_v33 = vcombine.high (!%p140_p2), %v170_v8, %v170_v8 }
   0x9   : > { %v299_v5 = vld [vmem:[#allocation2] sm:$0x1] (!%p140_p2)  ;;  %v1241_v6 = vshrl.u32 (!%p140_p2), %v305_v1, 7 }
   0xa   : > { %302 = vperm.xlu0 (!%p140_p2), %1132, %v299_v5   ;;  %v313_v7 = vunpack.c.0.s8 (!%p140_p2), %v312_v3 }
   0xc   : > { %v1253_v9 = vsub.s32 (!%p140_p2), %v313_v7, %v1241_v6 }
   0xe   : > { %v1258_v12 = vrot.slane (!%p140_p2), %v170_v8, %v1253_v9  ;;  %v1285_v38 = vrot.slane (!%p140_p2), %v310_v33, %v1253_v9 }
   0xf   : > { %s1348_s15 = smov (!%p161_p3, %s960_s15), 1 }
  0x10   : > { %s1033_s2 = sshll.u32 %s1348_s15, 9  ;;  %v325_v15 = vcombine.high %v1258_v12, %v1258_v12  ;;  %v326_v43 = vcombine.high %v1285_v38, %v1285_v38  ;;  %v333_v46 = vrot.slane %v1258_v12, %v1253_v9  ;;  %s168_s23 = scalar_lea.vmem %s1346_s3, %s1348_s15 }
  0x11   : > { %s1250_s20 = scalar_lea.vmem %s1343_s0, %s1033_s2 }
  0x12   : > { %v1133_v10 = vld [vmem:[%s1250_s20 + $0x40] sm:$0xff]   ;;  %v1137_v16 = vld [vmem:[%s1250_s20 + $0x48] sm:$0xff]   ;;  %v347_v18 = vrot.slane %v325_v15, %v1253_v9  ;;  %v1141_v22 = vld [vmem:[%s1250_s20 + $0x50] sm:$0xff]   ;;  %v354_v49 = vrot.slane %v326_v43, %v1253_v9  ;;  %v355_v51 = vcombine.high %v333_v46, %v333_v46 }
  0x13   : > { %v1134_v11 = vld [vmem:[%s1250_s20 + $0xc0] sm:$0xff]   ;;  %1034 = vmatprep.subr.bf16.mxu0 %v1133_v10  ;;  %v1138_v17 = vld [vmem:[%s1250_s20 + $0xc8] sm:$0xff]   ;;  %v1142_v23 = vld [vmem:[%s1250_s20 + $0xd0] sm:$0xff]  }
  0x14   : > { %v1135_v13 = vld [vmem:[%s1250_s20] sm:$0xff]   ;;  %1056 = vmatprep.subr.bf16.mxu1 %v1134_v11  ;;  %v1139_v19 = vld [vmem:[%s1250_s20 + $0x8] sm:$0xff]   ;;  %783 = vmatprep.mubr.bf16.mxu0 %v347_v18  ;;  %v357_v21 = vcombine.high %v347_v18, %v347_v18  ;;  %v1143_v24 = vld [vmem:[%s1250_s20 + $0x10] sm:$0xff]   ;;  %v358_v55 = vcombine.high %v354_v49, %v354_v49 }
  0x15   : > { %v1136_v14 = vld [vmem:[%s1250_s20 + $0x80] sm:$0xff]   ;;  %1035 = vmatpush3.bf16.msra.mxu0 %v1135_v13  ;;  %v1140_v20 = vld [vmem:[%s1250_s20 + $0x88] sm:$0xff]   ;;  %v1144_v25 = vld [vmem:[%s1250_s20 + $0x90] sm:$0xff]  }
  0x16   : > { %1057 = vmatpush3.bf16.msra.mxu1 %v1136_v14  ;;  %1036 = vmatprep.subr.bf16.mxu0 %v1137_v16  ;;  %v1145_v26 = vld [vmem:[%s1250_s20 + $0x58] sm:$0xff]   ;;  %v1149_v30 = vld [vmem:[%s1250_s20 + $0x60] sm:$0xff]   ;;  %v1153_v35 = vld [vmem:[%s1250_s20 + $0x68] sm:$0xff]  }
  0x17   : > { %1058 = vmatprep.subr.bf16.mxu1 %v1138_v17  ;;  %823 = vmatprep.mubr.bf16.mxu1 %v357_v21  ;;  %v1146_v27 = vld [vmem:[%s1250_s20 + $0xd8] sm:$0xff]   ;;  %v1150_v31 = vld [vmem:[%s1250_s20 + $0xe0] sm:$0xff]   ;;  %v1154_v36 = vld [vmem:[%s1250_s20 + $0xe8] sm:$0xff]  }
  0x18   : > { %v1147_v28 = vld [vmem:[%s1250_s20 + $0x18] sm:$0xff]   ;;  %v1151_v32 = vld [vmem:[%s1250_s20 + $0x20] sm:$0xff]   ;;  %v1155_v37 = vld [vmem:[%s1250_s20 + $0x28] sm:$0xff]  }
  0x19   : > { %1037 = vmatpush3.bf16.msra.mxu0 %v1139_v19  ;;  %v1148_v29 = vld [vmem:[%s1250_s20 + $0x98] sm:$0xff]   ;;  %v1152_v34 = vld [vmem:[%s1250_s20 + $0xa0] sm:$0xff]   ;;  %v1156_v39 = vld [vmem:[%s1250_s20 + $0xa8] sm:$0xff]  }
  0x1a   : > { %1059 = vmatpush3.bf16.msra.mxu1 %v1140_v20  ;;  %1038 = vmatprep.subr.bf16.mxu0 %v1141_v22  ;;  %v1157_v40 = vld [vmem:[%s1250_s20 + $0x70] sm:$0xff]   ;;  %v1161_v45 = vld [vmem:[%s1250_s20 + $0x78] sm:$0xff]   ;;  %v1166_v52 = vld [vmem:[%s1250_s20 + $0x140] sm:$0xff]   ;;  %v340_v20 = vrot.slane %v1285_v38, %v1253_v9 }
  0x1b   : > { %1060 = vmatprep.subr.bf16.mxu1 %v1142_v23  ;;  %v1158_v41 = vld [vmem:[%s1250_s20 + $0xf0] sm:$0xff]   ;;  %v1162_v47 = vld [vmem:[%s1250_s20 + $0xf8] sm:$0xff]   ;;  %v1167_v53 = vld [vmem:[%s1250_s20 + $0x1c0] sm:$0xff]  }
  0x1c   : > { %v1159_v42 = vld [vmem:[%s1250_s20 + $0x30] sm:$0xff]   ;;  %v1163_v48 = vld [vmem:[%s1250_s20 + $0x38] sm:$0xff]   ;;  %v1168_v54 = vld [vmem:[%s1250_s20 + $0x100] sm:$0xff]  }
  0x1d   : > { %1039 = vmatpush3.bf16.msra.mxu0 %v1143_v24  ;;  %v1160_v44 = vld [vmem:[%s1250_s20 + $0xb0] sm:$0xff]   ;;  %v1164_v50 = vld [vmem:[%s1250_s20 + $0xb8] sm:$0xff]   ;;  %v1169_v56 = vld [vmem:[%s1250_s20 + $0x180] sm:$0xff]   ;;  %v356_v24 = vcombine.high %v340_v20, %v340_v20 }
  0x1e   : > { %1061 = vmatpush3.bf16.msra.mxu1 %v1144_v25  ;;  %1040 = vmatprep.subr.bf16.mxu0 %v1145_v26  ;;  %v1170_v57 = vld [vmem:[%s1250_s20 + $0x148] sm:$0xff]   ;;  %v1174_v61 = vld [vmem:[%s1250_s20 + $0x150] sm:$0xff]   ;;  %v1178_v1 = vld [vmem:[%s1250_s20 + $0x158] sm:$0xff]   ;;  %v307_v25 = vsub.s32 0, %v1241_v6 }
  0x1f   : > { %1062 = vmatprep.subr.bf16.mxu1 %v1146_v27  ;;  %v1171_v58 = vld [vmem:[%s1250_s20 + $0x1c8] sm:$0xff]   ;;  %v1175_v62 = vld [vmem:[%s1250_s20 + $0x1d0] sm:$0xff]   ;;  %v1179_v2 = vld [vmem:[%s1250_s20 + $0x1d8] sm:$0xff]  }
  0x20   : > { %v1172_v59 = vld [vmem:[%s1250_s20 + $0x108] sm:$0xff]   ;;  %v1176_v63 = vld [vmem:[%s1250_s20 + $0x110] sm:$0xff]   ;;  %v1180_v3 = vld [vmem:[%s1250_s20 + $0x118] sm:$0xff]  }
  0x21   : > { %1041 = vmatpush3.bf16.msra.mxu0 %v1147_v28  ;;  %v1173_v60 = vld [vmem:[%s1250_s20 + $0x188] sm:$0xff]   ;;  %v1177_v0 = vld [vmem:[%s1250_s20 + $0x190] sm:$0xff]   ;;  %v1181_v4 = vld [vmem:[%s1250_s20 + $0x198] sm:$0xff]  }
  0x22   : > { %1063 = vmatpush3.bf16.msra.mxu1 %v1148_v29  ;;  %1042 = vmatprep.subr.bf16.mxu0 %v1149_v30  ;;  %v1182_v5 = vld [vmem:[%s1250_s20 + $0x160] sm:$0xff]   ;;  %v1186_v11 = vld [vmem:[%s1250_s20 + $0x168] sm:$0xff]   ;;  %v1190_v15 = vld [vmem:[%s1250_s20 + $0x170] sm:$0xff]  }
  0x23   : > { %1064 = vmatprep.subr.bf16.mxu1 %v1150_v31  ;;  %v1183_v7 = vld [vmem:[%s1250_s20 + $0x1e0] sm:$0xff]   ;;  %v1187_v12 = vld [vmem:[%s1250_s20 + $0x1e8] sm:$0xff]   ;;  %v1191_v16 = vld [vmem:[%s1250_s20 + $0x1f0] sm:$0xff]  }
  0x24   : > { %v1184_v8 = vld [vmem:[%s1250_s20 + $0x120] sm:$0xff]   ;;  %v1188_v13 = vld [vmem:[%s1250_s20 + $0x128] sm:$0xff]   ;;  %v1192_v17 = vld [vmem:[%s1250_s20 + $0x130] sm:$0xff]  }
  0x25   : > { %1043 = vmatpush3.bf16.msra.mxu0 %v1151_v32  ;;  %v1185_v10 = vld [vmem:[%s1250_s20 + $0x1a0] sm:$0xff]   ;;  %v1189_v14 = vld [vmem:[%s1250_s20 + $0x1a8] sm:$0xff]   ;;  %v1193_v18 = vld [vmem:[%s1250_s20 + $0x1b0] sm:$0xff]  }
  0x26   : > { %1065 = vmatpush3.bf16.msra.mxu1 %v1152_v34  ;;  %1044 = vmatprep.subr.bf16.mxu0 %v1153_v35  ;;  %v1194_v19 = vld [vmem:[%s1250_s20 + $0x178] sm:$0xff]  }
  0x27   : > { %1066 = vmatprep.subr.bf16.mxu1 %v1154_v36  ;;  %v1195_v21 = vld [vmem:[%s1250_s20 + $0x1f8] sm:$0xff]  }
  0x28   : > { %v1196_v22 = vld [vmem:[%s1250_s20 + $0x138] sm:$0xff]  }
  0x29   : > { %1045 = vmatpush3.bf16.msra.mxu0 %v1155_v37  ;;  %v1197_v23 = vld [vmem:[%s1250_s20 + $0x1b8] sm:$0xff]  }
  0x2a   : > { %1067 = vmatpush3.bf16.msra.mxu1 %v1156_v39  ;;  %1046 = vmatprep.subr.bf16.mxu0 %v1157_v40 }
  0x2b   : > { %1068 = vmatprep.subr.bf16.mxu1 %v1158_v41 }
  0x2d   : > { %1047 = vmatpush3.bf16.msra.mxu0 %v1159_v42 }
  0x2e   : > { %1069 = vmatpush3.bf16.msra.mxu1 %v1160_v44  ;;  %1048 = vmatprep.subr.bf16.mxu0 %v1161_v45 }
  0x2f   : > { %1070 = vmatprep.subr.bf16.mxu1 %v1162_v47 }
  0x31   : > { %1049 = vmatpush3.bf16.msra.mxu0 %v1163_v48 }
  0x32   : > { %1071 = vmatpush3.bf16.msra.mxu1 %v1164_v50  ;;  %1078 = vmatprep.subr.bf16.mxu0 %v1166_v52 }
  0x33   : > { %1100 = vmatprep.subr.bf16.mxu1 %v1167_v53 }
  0x34   : > { %784 = vmatmul.mubr.bf16.vlgmr.msra.gmra.mrb[0].mxu0 %v333_v46 }
  0x35   : > { %824 = vmatmul.mubr.bf16.vlgmr.msra.gmra.mrb[0].mxu1 %v355_v51  ;;  %1079 = vmatpush3.bf16.msra.mxu0 %v1168_v54 }
  0x36   : > { %1101 = vmatpush3.bf16.msra.mxu1 %v1169_v56  ;;  %863 = vmatprep.mubr.bf16.mxu0 %v354_v49 }
  0x37   : > { %1080 = vmatprep.subr.bf16.mxu0 %v1170_v57  ;;  %903 = vmatprep.mubr.bf16.mxu1 %v358_v55 }
  0x38   : > { %1102 = vmatprep.subr.bf16.mxu1 %v1171_v58 }
  0x39   : > { %1081 = vmatpush3.bf16.msra.mxu0 %v1172_v59 }
  0x3a   : > { %1103 = vmatpush3.bf16.msra.mxu1 %v1173_v60  ;;  %1082 = vmatprep.subr.bf16.mxu0 %v1174_v61 }
  0x3b   : > { %1104 = vmatprep.subr.bf16.mxu1 %v1175_v62 }
  0x3d   : > { %1083 = vmatpush3.bf16.msra.mxu0 %v1176_v63 }
  0x3e   : > { %1105 = vmatpush3.bf16.msra.mxu1 %v1177_v0  ;;  %1084 = vmatprep.subr.bf16.mxu0 %v1178_v1 }
  0x3f   : > { %1106 = vmatprep.subr.bf16.mxu1 %v1179_v2 }
  0x41   : > { %1085 = vmatpush3.bf16.msra.mxu0 %v1180_v3 }
  0x42   : > { %1107 = vmatpush3.bf16.msra.mxu1 %v1181_v4  ;;  %1086 = vmatprep.subr.bf16.mxu0 %v1182_v5 }
  0x43   : > { %1108 = vmatprep.subr.bf16.mxu1 %v1183_v7 }
  0x45   : > { %1087 = vmatpush3.bf16.msra.mxu0 %v1184_v8 }
  0x46   : > { %1109 = vmatpush3.bf16.msra.mxu1 %v1185_v10  ;;  %1088 = vmatprep.subr.bf16.mxu0 %v1186_v11 }
  0x47   : > { %1110 = vmatprep.subr.bf16.mxu1 %v1187_v12 }
  0x49   : > { %1089 = vmatpush3.bf16.msra.mxu0 %v1188_v13 }
  0x4a   : > { %1111 = vmatpush3.bf16.msra.mxu1 %v1189_v14  ;;  %1090 = vmatprep.subr.bf16.mxu0 %v1190_v15 }
  0x4b   : > { %1112 = vmatprep.subr.bf16.mxu1 %v1191_v16 }
  0x4d   : > { %1091 = vmatpush3.bf16.msra.mxu0 %v1192_v17 }
  0x4e   : > { %1113 = vmatpush3.bf16.msra.mxu1 %v1193_v18  ;;  %1092 = vmatprep.subr.bf16.mxu0 %v1194_v19 }
  0x4f   : > { %1114 = vmatprep.subr.bf16.mxu1 %v1195_v21 }
  0x51   : > { %1093 = vmatpush3.bf16.msra.mxu0 %v1196_v22 }
  0x52   : > { %1115 = vmatpush3.bf16.msra.mxu1 %v1197_v23 }
  0x54   : > { %864 = vmatmul.mubr.bf16.vlgmr.msra.gmra.mrb[4].mxu0 %v340_v20 }
  0x55   : > { %904 = vmatmul.mubr.bf16.vlgmr.msra.gmra.mrb[4].mxu1 %v356_v24 }
  0x89   : > { %v303_v26 = vpop.permute.xlu0 %302 }
  0x8a   : > { %v308_v28 = vrot.slane %v303_v26, %v307_v25 }
 0x107   : > { %v1050_v27 = vpop.f32.mrb[0].mxu0 }
 0x108   : > { %v1072_v29 = vpop.f32.mrb[0].mxu1  ;;  %v1051_v30 = vpop.f32.mrb[1].mxu0 }
 0x109   : > { %v1052_v31 = vadd.f32 %v1051_v30, %v1050_v27  ;;  %v1073_v9 = vpop.f32.mrb[1].mxu1  ;;  %v1053_v32 = vpop.f32.mrb[2].mxu0 }
 0x10a   : > { %v1074_v33 = vadd.f32 %v1073_v9, %v1072_v29  ;;  %v1075_v34 = vpop.f32.mrb[2].mxu1  ;;  %v1054_v35 = vpop.f32.mrb[3].mxu0 }
 0x10b   : > { %v786_v36 = vadd.f32 %v1052_v31, %v308_v28  ;;  %v1076_v37 = vpop.f32.mrb[3].mxu1 }
 0x10d   : > { %v826_v38 = vadd.f32 %v1074_v33, %v786_v36 }
 0x127   : > { %v1094_v39 = vpop.f32.mrb[4].mxu0 }
 0x128   : > { %v1116_v40 = vpop.f32.mrb[4].mxu1  ;;  %v1095_v41 = vpop.f32.mrb[5].mxu0 }
 0x129   : > { %v1096_v42 = vadd.f32 %v1095_v41, %v1094_v39  ;;  %v1117_v6 = vpop.f32.mrb[5].mxu1  ;;  %v1097_v43 = vpop.f32.mrb[6].mxu0 }
 0x12a   : > { %v1118_v44 = vadd.f32 %v1117_v6, %v1116_v40  ;;  %v1119_v45 = vpop.f32.mrb[6].mxu1  ;;  %v1098_v46 = vpop.f32.mrb[7].mxu0 }
 0x12b   : > { %v866_v47 = vadd.f32 %v1096_v42, %v826_v38  ;;  %v1120_v48 = vpop.f32.mrb[7].mxu1 }
 0x12d   : > { %v906_v49 = vadd.f32 %v1118_v44, %v866_v47 }
 0x12f   : > { %912 = vst.msk [vmem:[%s168_s23] sm:$0x1] %vm911_vm0, %v906_v49 }
 0x130 PF: > { %s15_s14 = sadd.s32 1, %s1204_s14  }
 0x131   : > { %p12_p4 = scmp.ge.s32.totalorder %s15_s14, 4  }
 0x133   :  { %14 = sbr.rel (!%p12_p4) target bundleno = 3 (0x3), region = 62 }

</bundles_post_ra>
